<compile_context>
chip_gen: v6e
topology: v6e:2x2x1
jax: 0.10.0
libtpu: 0.0.40
codegen_flags: <defaults>
</compile_context>

<pallas_src>
import math
import functools

import jax
import jax.numpy as jnp
from jax.experimental import pallas as pl
from jax.experimental.pallas import tpu as pltpu


# ---------------------------------------------------------------------------
# small in-kernel math helpers (lower to VPU/EUP ops)
# ---------------------------------------------------------------------------

def _silu(x):
    return x * (1.0 / (1.0 + jnp.exp(-x)))


def _softplus(x):
    return jnp.maximum(x, 0.0) + jnp.log(1.0 + jnp.exp(-jnp.abs(x)))


def _layernorm(x, w, b, eps=1e-5):
    mu = jnp.mean(x, axis=-1, keepdims=True)
    var = jnp.mean((x - mu) ** 2, axis=-1, keepdims=True)
    return (x - mu) * jax.lax.rsqrt(var + eps) * w + b


# ---------------------------------------------------------------------------
# fused MixerModel kernel: (x + pos) -> depth x [h + Mamba(LN(h))] -> norm_f
# one grid step = one (batch element, layer) pair; layer axis is innermost.
# ---------------------------------------------------------------------------

def mixer_kernel(x_ref, pos_ref, nfw_ref, nfb_ref,
                 lnw_ref, lnb_ref, w_in_ref, conv_w_ref, conv_b_ref,
                 w_xp_ref, dt_w_ref, dt_b_ref, a_logt_ref, dpar_ref, w_out_ref,
                 out_ref, y_scr,
                 *, L, D, DI, DS, DR, DC):
    layer = pl.program_id(1)
    n_layers = pl.num_programs(1)

    # first layer for this batch block: hidden = input + pos  (MixerModel)
    @pl.when(layer == 0)
    def _():
        out_ref[...] = x_ref[...] + pos_ref[...]

    hidden = out_ref[0]                                          # (L, D) f32, VMEM-resident

    # ----- pre-norm (Block: h = h + Mamba(LayerNorm(h)), drop_path = 0) -----
    xn = _layernorm(hidden, lnw_ref[0], lnb_ref[0])              # (L, D)

    # ----- fused in_proj: (L, D) @ (D, 2*DI), bf16 operands / f32 accum -----
    xz = jnp.dot(xn.astype(jnp.bfloat16), w_in_ref[0],
                 preferred_element_type=jnp.float32)             # (L, 2*DI)
    xi = xz[:, :DI]
    z = xz[:, DI:]

    # ----- depthwise causal conv1d (kernel DC, left pad DC-1) + SiLU -----
    cw = conv_w_ref[0]                                           # (DC, DI), hoisted
    xi_pad = jnp.concatenate(
        [jnp.zeros((DC - 1, DI), jnp.float32), xi], axis=0)      # (L+DC-1, DI)
    acc = jnp.broadcast_to(conv_b_ref[0], (L, DI))               # hoisted bias bcast
    for k in range(DC):                                          # DC static shifted FMAs
        acc = acc + xi_pad[k:k + L, :] * cw[k:k + 1, :]
    xc = _silu(acc)                                              # (L, DI)

    # ----- fused x_proj: (L, DI) @ (DI, DR + 2*DS) -----
    xproj = jnp.dot(xc.astype(jnp.bfloat16), w_xp_ref[0],
                    preferred_element_type=jnp.float32)          # (L, DR+2*DS)
    dt_in = xproj[:, :DR]                                        # (L, DR)
    bc_t = xproj[:, DR:DR + 2 * DS].T                            # (2*DS, L): one small transpose
    b_cols = bc_t[:DS, :]                                        # (DS, L)
    c_cols = bc_t[DS:, :]                                        # (DS, L)

    # ----- dt projection (K = DR tiny): unrolled VPU FMAs, then softplus -----
    dt_w = dt_w_ref[0]                                           # (DR, DI)
    dt_lin = jnp.broadcast_to(dt_b_ref[0], (L, DI))
    for r in range(DR):
        dt_lin = dt_lin + dt_in[:, r:r + 1] * dt_w[r:r + 1, :]
    dt = _softplus(dt_lin)                                       # (L, DI)

    # ----- selective scan: state (DS, DI) -> DI lane-dense, DS on sublanes ----
    a_mat = -jnp.exp(a_logt_ref[0])                              # (DS, DI), hoisted
    dpar = dpar_ref[0]                                           # (1, DI), hoisted
    h = jnp.zeros((DS, DI), jnp.float32)
    for t in range(L):
        dt_t = dt[t:t + 1, :]                                    # (1, DI)
        x_t = xc[t:t + 1, :]                                     # (1, DI)
        h = jnp.exp(dt_t * a_mat) * h + (dt_t * x_t) * b_cols[:, t:t + 1]
        # y_t = C_t . h_t  (sublane reduce)  +  D * x_t  -> scratch row t
        y_scr[t:t + 1, :] = (jnp.sum(h * c_cols[:, t:t + 1], axis=0, keepdims=True)
                             + dpar * x_t)

    y = y_scr[...] * _silu(z)                                    # (L, DI)

    # ----- out_proj + residual -----
    dout = jnp.dot(y.astype(jnp.bfloat16), w_out_ref[0],
                   preferred_element_type=jnp.float32)           # (L, D)
    new_h = hidden + dout

    # final MixerModel norm_f only after the last layer (cheap; select result)
    normed = _layernorm(new_h, nfw_ref[...], nfb_ref[...])
    out_ref[0] = jnp.where(layer == n_layers - 1, normed, new_h)


def mixer_model_forward(params, cfg, x, pos):
    B, L, D = x.shape
    depth = params['w_in'].shape[0]
    DI, DS, DR, DC = cfg['d_inner'], cfg['d_state'], cfg['dt_rank'], cfg['d_conv']

    def rep(shape):   # layer-streamed weight: block = one layer's slab
        return pl.BlockSpec((1,) + shape, lambda b, l: (l,) + (0,) * len(shape))

    hid_spec = pl.BlockSpec((1, L, D), lambda b, l: (b, 0, 0))
    const2 = pl.BlockSpec((1, D), lambda b, l: (0, 0))

    kernel = functools.partial(mixer_kernel, L=L, D=D, DI=DI, DS=DS, DR=DR, DC=DC)
    return pl.pallas_call(
        kernel,
        out_shape=jax.ShapeDtypeStruct((B, L, D), jnp.float32),
        grid_spec=pltpu.PrefetchScalarGridSpec(
            num_scalar_prefetch=0,
            grid=(B, depth),
            in_specs=[
                hid_spec, hid_spec,              # x, pos
                const2, const2,                  # norm_f weight / bias
                rep((1, D)), rep((1, D)),        # per-layer LN weight / bias
                rep((D, 2 * DI)),                # fused in_proj
                rep((DC, DI)), rep((1, DI)),     # depthwise conv weight / bias
                rep((DI, DR + 2 * DS)),          # fused x_proj (dt | B | C)
                rep((DR, DI)), rep((1, DI)),     # dt_proj weight / bias
                rep((DS, DI)), rep((1, DI)),     # A_log (transposed), D
                rep((DI, D)),                    # out_proj
            ],
            out_specs=hid_spec,                  # resident across depth axis
            scratch_shapes=[pltpu.VMEM((L, DI), jnp.float32)],
        ),
        compiler_params=pltpu.CompilerParams(
            dimension_semantics=("parallel", "arbitrary"),
            vmem_limit_bytes=32 * 1024 * 1024,
        ),
    )(x, pos, params['norm_f_w'], params['norm_f_b'],
      params['ln_w'], params['ln_b'], params['w_in'],
      params['conv_w'], params['conv_b'], params['w_xproj'],
      params['dt_w'], params['dt_b'], params['A_logT'], params['D'],
      params['w_out'])


# ---------------------------------------------------------------------------
# MambaDecoder forward: blocks(x, pos) then x[mask_pos, :].view(B, -1, C)
# ---------------------------------------------------------------------------

def mamba_decoder_forward(params, cfg, x, pos, mask_pos, num_mask):
    B, L, C = x.shape
    hidden = mixer_model_forward(params, cfg, x, pos)            # (B, L, C)
    # Boolean-mask gather preserving per-row order (== x[mask_pos].view(B,-1,C)).
    # NOTE: stable=True is load-bearing for matching boolean-indexing order.
    order = jnp.argsort(jnp.logical_not(mask_pos).astype(jnp.int32),
                        axis=1, stable=True)
    idx = order[:, :num_mask]                                    # (B, num_mask)
    return jnp.take_along_axis(hidden, idx[:, :, None], axis=1)  # (B, num_mask, C)


# ---------------------------------------------------------------------------
# deterministic synthetic parameters (canonical Mamba: d_state=16, d_conv=4,
# expand=2, dt_rank=ceil(d_model/16)); weights stacked along a leading depth
# axis so a single depth-grid kernel can stream them.
# ---------------------------------------------------------------------------

def init_params(key, d_model, depth, d_state=16, d_conv=4, expand=2):
    d_inner = expand * d_model
    dt_rank = math.ceil(d_model / 16)
    keys = iter(jax.random.split(key, 32))

    def nrm(shape, std=0.02, dtype=jnp.float32):
        return (std * jax.random.normal(next(keys), shape,
                                        dtype=jnp.float32)).astype(dtype)

    # A_log stored pre-transposed: (depth, d_state, d_inner), A_log[s, :] = log(s+1)
    a_logt = jnp.log(jnp.arange(1, d_state + 1, dtype=jnp.float32))
    a_logt = jnp.broadcast_to(a_logt[None, :, None], (depth, d_state, d_inner))

    params = {
        'norm_f_w': jnp.ones((1, d_model), jnp.float32),
        'norm_f_b': jnp.zeros((1, d_model), jnp.float32),
        'ln_w': jnp.ones((depth, 1, d_model), jnp.float32),
        'ln_b': jnp.zeros((depth, 1, d_model), jnp.float32),
        # MXU-facing weights stored bf16 (f32 accumulation in-kernel).
        'w_in': nrm((depth, d_model, 2 * d_inner), dtype=jnp.bfloat16),
        'conv_w': nrm((depth, d_conv, d_inner)),
        'conv_b': jnp.zeros((depth, 1, d_inner), jnp.float32),
        'w_xproj': nrm((depth, d_inner, dt_rank + 2 * d_state), dtype=jnp.bfloat16),
        'dt_w': nrm((depth, dt_rank, d_inner)),
        'dt_b': jnp.zeros((depth, 1, d_inner), jnp.float32),
        'A_logT': jnp.asarray(a_logt, jnp.float32),
        'D': jnp.ones((depth, 1, d_inner), jnp.float32),
        'w_out': nrm((depth, d_inner, d_model), dtype=jnp.bfloat16),
    }
    cfg = dict(d_inner=d_inner, d_state=d_state, d_conv=d_conv, dt_rank=dt_rank)
    return params, cfg


def make_mask(key, B, L, num_mask):
    base = jnp.concatenate([jnp.zeros((L - num_mask,), bool),
                            jnp.ones((num_mask,), bool)])
    rows = [jax.random.permutation(jax.random.fold_in(key, i), base)
            for i in range(B)]
    return jnp.stack(rows)


if __name__ == "__main__":
    key = jax.random.PRNGKey(0)
    B, L = 2, 8            # batch, total tokens (visible + mask tokens)
    d_model = 64           # embed_dim -> d_inner = 128 (exactly one lane group)
    depth = 2
    num_mask = 4

    k_x, k_pos, k_par, k_msk = jax.random.split(key, 4)
    x = jax.random.normal(k_x, (B, L, d_model), dtype=jnp.float32)
    pos = jax.random.normal(k_pos, (B, L, d_model), dtype=jnp.float32)
    mask_pos = make_mask(k_msk, B, L, num_mask)

    params, cfg = init_params(k_par, d_model, depth)

    out = mamba_decoder_forward(params, cfg, x, pos, mask_pos, num_mask)
    jax.block_until_ready(out)

    assert out.shape == (B, num_mask, d_model)
    assert bool(jnp.all(jnp.isfinite(out)))
    print("KERNEL_OK")
</pallas_src>

<mosaic_0001>
module attributes {stable_mosaic.version = 11 : i64} {
  func.func @mixer_kernel(%arg0: i32, %arg1: i32, %arg2: memref<1x8x64xf32, #tpu.memory_space<vmem>>, %arg3: memref<1x8x64xf32, #tpu.memory_space<vmem>>, %arg4: memref<1x64xf32, #tpu.memory_space<vmem>>, %arg5: memref<1x64xf32, #tpu.memory_space<vmem>>, %arg6: memref<1x1x64xf32, #tpu.memory_space<vmem>>, %arg7: memref<1x1x64xf32, #tpu.memory_space<vmem>>, %arg8: memref<1x64x256xbf16, #tpu.memory_space<vmem>>, %arg9: memref<1x4x128xf32, #tpu.memory_space<vmem>>, %arg10: memref<1x1x128xf32, #tpu.memory_space<vmem>>, %arg11: memref<1x128x36xbf16, #tpu.memory_space<vmem>>, %arg12: memref<1x4x128xf32, #tpu.memory_space<vmem>>, %arg13: memref<1x1x128xf32, #tpu.memory_space<vmem>>, %arg14: memref<1x16x128xf32, #tpu.memory_space<vmem>>, %arg15: memref<1x1x128xf32, #tpu.memory_space<vmem>>, %arg16: memref<1x128x64xbf16, #tpu.memory_space<vmem>>, %arg17: memref<1x8x64xf32, #tpu.memory_space<vmem>>, %arg18: memref<8x128xf32, #tpu.memory_space<vmem>>) attributes {dimension_semantics = [#tpu.dimension_semantics<parallel>, #tpu.dimension_semantics<arbitrary>], iteration_bounds = array<i64: 2, 2>, scalar_prefetch = 0 : i64, scratch_operands = 1 : i64, tpu.core_type = #tpu.core_type<tc>, window_params = [{transform_indices = @transform_0, window_bounds = array<i64: 1, 8, 64>}, {transform_indices = @transform_1, window_bounds = array<i64: 1, 8, 64>}, {pipeline_mode = #tpu.pipeline_mode<synchronous>, transform_indices = @transform_2, window_bounds = array<i64: 1, 64>}, {pipeline_mode = #tpu.pipeline_mode<synchronous>, transform_indices = @transform_3, window_bounds = array<i64: 1, 64>}, {transform_indices = @transform_4, window_bounds = array<i64: 1, 1, 64>}, {transform_indices = @transform_5, window_bounds = array<i64: 1, 1, 64>}, {transform_indices = @transform_6, window_bounds = array<i64: 1, 64, 256>}, {transform_indices = @transform_7, window_bounds = array<i64: 1, 4, 128>}, {transform_indices = @transform_8, window_bounds = array<i64: 1, 1, 128>}, {transform_indices = @transform_9, window_bounds = array<i64: 1, 128, 36>}, {transform_indices = @transform_10, window_bounds = array<i64: 1, 4, 128>}, {transform_indices = @transform_11, window_bounds = array<i64: 1, 1, 128>}, {transform_indices = @transform_12, window_bounds = array<i64: 1, 16, 128>}, {transform_indices = @transform_13, window_bounds = array<i64: 1, 1, 128>}, {transform_indices = @transform_14, window_bounds = array<i64: 1, 128, 64>}, {transform_indices = @transform_15, window_bounds = array<i64: 1, 8, 64>}]} {
    %c0_i32 = arith.constant 0 : i32
    %0 = arith.cmpi eq, %arg1, %c0_i32 : i32
    %1 = arith.extui %0 : i1 to i32
    %c0_i32_0 = arith.constant 0 : i32
    %2 = arith.cmpi ne, %1, %c0_i32_0 : i32
    scf.if %2 {
      %c0_86 = arith.constant 0 : index
      %c0_87 = arith.constant 0 : index
      %c0_88 = arith.constant 0 : index
      %334 = vector.load %arg2[%c0_86, %c0_87, %c0_88] : memref<1x8x64xf32, #tpu.memory_space<vmem>>, vector<1x8x64xf32>
      %c0_89 = arith.constant 0 : index
      %c0_90 = arith.constant 0 : index
      %c0_91 = arith.constant 0 : index
      %335 = vector.load %arg3[%c0_89, %c0_90, %c0_91] : memref<1x8x64xf32, #tpu.memory_space<vmem>>, vector<1x8x64xf32>
      %336 = arith.addf %334, %335 : vector<1x8x64xf32>
      %c0_92 = arith.constant 0 : index
      %c0_93 = arith.constant 0 : index
      %c0_94 = arith.constant 0 : index
      %337 = vector.load %arg17[%c0_92, %c0_93, %c0_94] : memref<1x8x64xf32, #tpu.memory_space<vmem>>, vector<1x8x64xf32>
      tpu.vector_store %arg17[%c0_92, %c0_93, %c0_94], %336 {strides = array<i32>} : memref<1x8x64xf32, #tpu.memory_space<vmem>>, vector<1x8x64xf32>,
    } else {
    }
    %c0 = arith.constant 0 : index
    %c0_1 = arith.constant 0 : index
    %c0_2 = arith.constant 0 : index
    %3 = vector.load %arg17[%c0, %c0_1, %c0_2] : memref<1x8x64xf32, #tpu.memory_space<vmem>>, vector<1x8x64xf32>
    %4 = vector.shape_cast %3 : vector<1x8x64xf32> to vector<8x64xf32>
    %c0_3 = arith.constant 0 : index
    %c0_4 = arith.constant 0 : index
    %c0_5 = arith.constant 0 : index
    %5 = vector.load %arg6[%c0_3, %c0_4, %c0_5] : memref<1x1x64xf32, #tpu.memory_space<vmem>>, vector<1x1x64xf32>
    %6 = vector.shape_cast %5 : vector<1x1x64xf32> to vector<1x64xf32>
    %c0_6 = arith.constant 0 : index
    %c0_7 = arith.constant 0 : index
    %c0_8 = arith.constant 0 : index
    %7 = vector.load %arg7[%c0_6, %c0_7, %c0_8] : memref<1x1x64xf32, #tpu.memory_space<vmem>>, vector<1x1x64xf32>
    %8 = vector.shape_cast %7 : vector<1x1x64xf32> to vector<1x64xf32>
    %cst = arith.constant dense<0.000000e+00> : vector<8xf32>
    %9 = vector.multi_reduction <add>, %4, %cst [1] : vector<8x64xf32> to vector<8xf32>
    %10 = vector.shape_cast %9 : vector<8xf32> to vector<8x1xf32>
    %cst_9 = arith.constant 6.400000e+01 : f32
    %11 = vector.broadcast %cst_9 : f32 to vector<8x1xf32>
    %12 = arith.divf %10, %11 : vector<8x1xf32>
    %13 = vector.broadcast %12 : vector<8x1xf32> to vector<8x64xf32>
    %14 = arith.subf %4, %13 : vector<8x64xf32>
    %15 = arith.mulf %14, %14 : vector<8x64xf32>
    %cst_10 = arith.constant dense<0.000000e+00> : vector<8xf32>
    %16 = vector.multi_reduction <add>, %15, %cst_10 [1] : vector<8x64xf32> to vector<8xf32>
    %17 = vector.shape_cast %16 : vector<8xf32> to vector<8x1xf32>
    %cst_11 = arith.constant 6.400000e+01 : f32
    %18 = vector.broadcast %cst_11 : f32 to vector<8x1xf32>
    %19 = arith.divf %17, %18 : vector<8x1xf32>
    %20 = vector.broadcast %12 : vector<8x1xf32> to vector<8x64xf32>
    %21 = arith.subf %4, %20 : vector<8x64xf32>
    %cst_12 = arith.constant 9.99999974E-6 : f32
    %22 = vector.broadcast %cst_12 : f32 to vector<8x1xf32>
    %23 = arith.addf %19, %22 : vector<8x1xf32>
    %24 = math.rsqrt %23 : vector<8x1xf32>
    %25 = vector.broadcast %24 : vector<8x1xf32> to vector<8x64xf32>
    %26 = arith.mulf %21, %25 : vector<8x64xf32>
    %27 = vector.broadcast %6 : vector<1x64xf32> to vector<8x64xf32>
    %28 = arith.mulf %26, %27 : vector<8x64xf32>
    %29 = vector.broadcast %8 : vector<1x64xf32> to vector<8x64xf32>
    %30 = arith.addf %28, %29 : vector<8x64xf32>
    %31 = arith.truncf %30 : vector<8x64xf32> to vector<8x64xbf16>
    %c0_13 = arith.constant 0 : index
    %c0_14 = arith.constant 0 : index
    %c0_15 = arith.constant 0 : index
    %32 = vector.load %arg8[%c0_13, %c0_14, %c0_15] : memref<1x64x256xbf16, #tpu.memory_space<vmem>>, vector<1x64x256xbf16>
    %33 = vector.shape_cast %32 : vector<1x64x256xbf16> to vector<64x256xbf16>
    %cst_16 = arith.constant dense<0.000000e+00> : vector<8x256xf32>
    %34 = tpu.matmul %31, %33, %cst_16 {dimension_numbers = #tpu.dot_dimension_numbers<[1], [0], [0], [1], [0, 0, 1, 1], [], []>} : vector<8x64xbf16>, vector<64x256xbf16>, vector<8x256xf32> -> vector<8x256xf32>
    %35 = vector.extract_strided_slice %34 {offsets = [0, 0], sizes = [8, 128], strides = [1, 1]} : vector<8x256xf32> to vector<8x128xf32>
    %36 = vector.extract_strided_slice %34 {offsets = [0, 128], sizes = [8, 128], strides = [1, 1]} : vector<8x256xf32> to vector<8x128xf32>
    %c0_17 = arith.constant 0 : index
    %c0_18 = arith.constant 0 : index
    %c0_19 = arith.constant 0 : index
    %37 = vector.load %arg9[%c0_17, %c0_18, %c0_19] : memref<1x4x128xf32, #tpu.memory_space<vmem>>, vector<1x4x128xf32>
    %38 = vector.shape_cast %37 : vector<1x4x128xf32> to vector<4x128xf32>
    %cst_20 = arith.constant 0.000000e+00 : f32
    %39 = vector.broadcast %cst_20 : f32 to vector<3x128xf32>
    %40 = tpu.concatenate %39, %35 in 0 : vector<3x128xf32>, vector<8x128xf32> -> vector<11x128xf32>
    %c0_21 = arith.constant 0 : index
    %c0_22 = arith.constant 0 : index
    %c0_23 = arith.constant 0 : index
    %41 = vector.load %arg10[%c0_21, %c0_22, %c0_23] : memref<1x1x128xf32, #tpu.memory_space<vmem>>, vector<1x1x128xf32>
    %42 = vector.shape_cast %41 : vector<1x1x128xf32> to vector<1x128xf32>
    %43 = vector.shape_cast %42 : vector<1x128xf32> to vector<1x128xf32>
    %44 = vector.broadcast %43 : vector<1x128xf32> to vector<8x128xf32>
    %45 = vector.extract_strided_slice %40 {offsets = [0, 0], sizes = [8, 128], strides = [1, 1]} : vector<11x128xf32> to vector<8x128xf32>
    %46 = vector.extract_strided_slice %38 {offsets = [0, 0], sizes = [1, 128], strides = [1, 1]} : vector<4x128xf32> to vector<1x128xf32>
    %47 = vector.broadcast %46 : vector<1x128xf32> to vector<8x128xf32>
    %48 = arith.mulf %45, %47 : vector<8x128xf32>
    %49 = arith.addf %44, %48 : vector<8x128xf32>
    %50 = vector.extract_strided_slice %40 {offsets = [1, 0], sizes = [8, 128], strides = [1, 1]} : vector<11x128xf32> to vector<8x128xf32>
    %51 = vector.extract_strided_slice %38 {offsets = [1, 0], sizes = [1, 128], strides = [1, 1]} : vector<4x128xf32> to vector<1x128xf32>
    %52 = vector.broadcast %51 : vector<1x128xf32> to vector<8x128xf32>
    %53 = arith.mulf %50, %52 : vector<8x128xf32>
    %54 = arith.addf %49, %53 : vector<8x128xf32>
    %55 = vector.extract_strided_slice %40 {offsets = [2, 0], sizes = [8, 128], strides = [1, 1]} : vector<11x128xf32> to vector<8x128xf32>
    %56 = vector.extract_strided_slice %38 {offsets = [2, 0], sizes = [1, 128], strides = [1, 1]} : vector<4x128xf32> to vector<1x128xf32>
    %57 = vector.broadcast %56 : vector<1x128xf32> to vector<8x128xf32>
    %58 = arith.mulf %55, %57 : vector<8x128xf32>
    %59 = arith.addf %54, %58 : vector<8x128xf32>
    %60 = vector.extract_strided_slice %40 {offsets = [3, 0], sizes = [8, 128], strides = [1, 1]} : vector<11x128xf32> to vector<8x128xf32>
    %61 = vector.extract_strided_slice %38 {offsets = [3, 0], sizes = [1, 128], strides = [1, 1]} : vector<4x128xf32> to vector<1x128xf32>
    %62 = vector.broadcast %61 : vector<1x128xf32> to vector<8x128xf32>
    %63 = arith.mulf %60, %62 : vector<8x128xf32>
    %64 = arith.addf %59, %63 : vector<8x128xf32>
    %cst_24 = arith.constant 0.000000e+00 : f32
    %65 = vector.broadcast %cst_24 : f32 to vector<8x128xf32>
    %66 = arith.subf %65, %64 : vector<8x128xf32>
    %67 = math.exp %66 : vector<8x128xf32>
    %cst_25 = arith.constant 1.000000e+00 : f32
    %68 = vector.broadcast %cst_25 : f32 to vector<8x128xf32>
    %69 = arith.addf %68, %67 : vector<8x128xf32>
    %cst_26 = arith.constant 1.000000e+00 : f32
    %70 = vector.broadcast %cst_26 : f32 to vector<8x128xf32>
    %71 = arith.divf %70, %69 : vector<8x128xf32>
    %72 = arith.mulf %64, %71 : vector<8x128xf32>
    %73 = arith.truncf %72 : vector<8x128xf32> to vector<8x128xbf16>
    %c0_27 = arith.constant 0 : index
    %c0_28 = arith.constant 0 : index
    %c0_29 = arith.constant 0 : index
    %74 = vector.load %arg11[%c0_27, %c0_28, %c0_29] : memref<1x128x36xbf16, #tpu.memory_space<vmem>>, vector<1x128x36xbf16>
    %75 = vector.shape_cast %74 : vector<1x128x36xbf16> to vector<128x36xbf16>
    %cst_30 = arith.constant dense<0.000000e+00> : vector<8x36xf32>
    %76 = tpu.matmul %73, %75, %cst_30 {dimension_numbers = #tpu.dot_dimension_numbers<[1], [0], [0], [1], [0, 0, 1, 1], [], []>} : vector<8x128xbf16>, vector<128x36xbf16>, vector<8x36xf32> -> vector<8x36xf32>
    %77 = vector.extract_strided_slice %76 {offsets = [0, 0], sizes = [8, 4], strides = [1, 1]} : vector<8x36xf32> to vector<8x4xf32>
    %78 = vector.extract_strided_slice %76 {offsets = [0, 4], sizes = [8, 32], strides = [1, 1]} : vector<8x36xf32> to vector<8x32xf32>
    %79 = tpu.transpose %78, [1, 0] : vector<8x32xf32> -> vector<32x8xf32>
    %80 = vector.extract_strided_slice %79 {offsets = [0, 0], sizes = [16, 8], strides = [1, 1]} : vector<32x8xf32> to vector<16x8xf32>
    %81 = vector.extract_strided_slice %79 {offsets = [16, 0], sizes = [16, 8], strides = [1, 1]} : vector<32x8xf32> to vector<16x8xf32>
    %c0_31 = arith.constant 0 : index
    %c0_32 = arith.constant 0 : index
    %c0_33 = arith.constant 0 : index
    %82 = vector.load %arg12[%c0_31, %c0_32, %c0_33] : memref<1x4x128xf32, #tpu.memory_space<vmem>>, vector<1x4x128xf32>
    %83 = vector.shape_cast %82 : vector<1x4x128xf32> to vector<4x128xf32>
    %c0_34 = arith.constant 0 : index
    %c0_35 = arith.constant 0 : index
    %c0_36 = arith.constant 0 : index
    %84 = vector.load %arg13[%c0_34, %c0_35, %c0_36] : memref<1x1x128xf32, #tpu.memory_space<vmem>>, vector<1x1x128xf32>
    %85 = vector.shape_cast %84 : vector<1x1x128xf32> to vector<1x128xf32>
    %86 = vector.shape_cast %85 : vector<1x128xf32> to vector<1x128xf32>
    %87 = vector.broadcast %86 : vector<1x128xf32> to vector<8x128xf32>
    %88 = vector.extract_strided_slice %77 {offsets = [0, 0], sizes = [8, 1], strides = [1, 1]} : vector<8x4xf32> to vector<8x1xf32>
    %89 = vector.extract_strided_slice %83 {offsets = [0, 0], sizes = [1, 128], strides = [1, 1]} : vector<4x128xf32> to vector<1x128xf32>
    %90 = vector.broadcast %88 : vector<8x1xf32> to vector<8x128xf32>
    %91 = vector.broadcast %89 : vector<1x128xf32> to vector<8x128xf32>
    %92 = arith.mulf %90, %91 : vector<8x128xf32>
    %93 = arith.addf %87, %92 : vector<8x128xf32>
    %94 = vector.extract_strided_slice %77 {offsets = [0, 1], sizes = [8, 1], strides = [1, 1]} : vector<8x4xf32> to vector<8x1xf32>
    %95 = vector.extract_strided_slice %83 {offsets = [1, 0], sizes = [1, 128], strides = [1, 1]} : vector<4x128xf32> to vector<1x128xf32>
    %96 = vector.broadcast %94 : vector<8x1xf32> to vector<8x128xf32>
    %97 = vector.broadcast %95 : vector<1x128xf32> to vector<8x128xf32>
    %98 = arith.mulf %96, %97 : vector<8x128xf32>
    %99 = arith.addf %93, %98 : vector<8x128xf32>
    %100 = vector.extract_strided_slice %77 {offsets = [0, 2], sizes = [8, 1], strides = [1, 1]} : vector<8x4xf32> to vector<8x1xf32>
    %101 = vector.extract_strided_slice %83 {offsets = [2, 0], sizes = [1, 128], strides = [1, 1]} : vector<4x128xf32> to vector<1x128xf32>
    %102 = vector.broadcast %100 : vector<8x1xf32> to vector<8x128xf32>
    %103 = vector.broadcast %101 : vector<1x128xf32> to vector<8x128xf32>
    %104 = arith.mulf %102, %103 : vector<8x128xf32>
    %105 = arith.addf %99, %104 : vector<8x128xf32>
    %106 = vector.extract_strided_slice %77 {offsets = [0, 3], sizes = [8, 1], strides = [1, 1]} : vector<8x4xf32> to vector<8x1xf32>
    %107 = vector.extract_strided_slice %83 {offsets = [3, 0], sizes = [1, 128], strides = [1, 1]} : vector<4x128xf32> to vector<1x128xf32>
    %108 = vector.broadcast %106 : vector<8x1xf32> to vector<8x128xf32>
    %109 = vector.broadcast %107 : vector<1x128xf32> to vector<8x128xf32>
    %110 = arith.mulf %108, %109 : vector<8x128xf32>
    %111 = arith.addf %105, %110 : vector<8x128xf32>
    %cst_37 = arith.constant 0.000000e+00 : f32
    %112 = vector.broadcast %cst_37 : f32 to vector<8x128xf32>
    %113 = arith.maximumf %111, %112 : vector<8x128xf32>
    %114 = math.absf %111 : vector<8x128xf32>
    %cst_38 = arith.constant 0.000000e+00 : f32
    %115 = vector.broadcast %cst_38 : f32 to vector<8x128xf32>
    %116 = arith.subf %115, %114 : vector<8x128xf32>
    %117 = math.exp %116 : vector<8x128xf32>
    %cst_39 = arith.constant 1.000000e+00 : f32
    %118 = vector.broadcast %cst_39 : f32 to vector<8x128xf32>
    %119 = arith.addf %118, %117 : vector<8x128xf32>
    %120 = math.log %119 : vector<8x128xf32>
    %121 = arith.addf %113, %120 : vector<8x128xf32>
    %c0_40 = arith.constant 0 : index
    %c0_41 = arith.constant 0 : index
    %c0_42 = arith.constant 0 : index
    %122 = vector.load %arg14[%c0_40, %c0_41, %c0_42] : memref<1x16x128xf32, #tpu.memory_space<vmem>>, vector<1x16x128xf32>
    %123 = vector.shape_cast %122 : vector<1x16x128xf32> to vector<16x128xf32>
    %124 = math.exp %123 : vector<16x128xf32>
    %cst_43 = arith.constant 0.000000e+00 : f32
    %125 = vector.broadcast %cst_43 : f32 to vector<16x128xf32>
    %126 = arith.subf %125, %124 : vector<16x128xf32>
    %c0_44 = arith.constant 0 : index
    %c0_45 = arith.constant 0 : index
    %c0_46 = arith.constant 0 : index
    %127 = vector.load %arg15[%c0_44, %c0_45, %c0_46] : memref<1x1x128xf32, #tpu.memory_space<vmem>>, vector<1x1x128xf32>
    %128 = vector.shape_cast %127 : vector<1x1x128xf32> to vector<1x128xf32>
    %cst_47 = arith.constant 0.000000e+00 : f32
    %129 = vector.broadcast %cst_47 : f32 to vector<16x128xf32>
    %130 = vector.extract_strided_slice %121 {offsets = [0, 0], sizes = [1, 128], strides = [1, 1]} : vector<8x128xf32> to vector<1x128xf32>
    %131 = vector.extract_strided_slice %72 {offsets = [0, 0], sizes = [1, 128], strides = [1, 1]} : vector<8x128xf32> to vector<1x128xf32>
    %132 = vector.broadcast %130 : vector<1x128xf32> to vector<16x128xf32>
    %133 = arith.mulf %132, %126 : vector<16x128xf32>
    %134 = math.exp %133 : vector<16x128xf32>
    %135 = arith.mulf %134, %129 : vector<16x128xf32>
    %136 = arith.mulf %130, %131 : vector<1x128xf32>
    %137 = vector.extract_strided_slice %80 {offsets = [0, 0], sizes = [16, 1], strides = [1, 1]} : vector<16x8xf32> to vector<16x1xf32>
    %138 = vector.broadcast %136 : vector<1x128xf32> to vector<16x128xf32>
    %139 = vector.broadcast %137 : vector<16x1xf32> to vector<16x128xf32>
    %140 = arith.mulf %138, %139 : vector<16x128xf32>
    %141 = arith.addf %135, %140 : vector<16x128xf32>
    %142 = vector.extract_strided_slice %81 {offsets = [0, 0], sizes = [16, 1], strides = [1, 1]} : vector<16x8xf32> to vector<16x1xf32>
    %143 = vector.broadcast %142 : vector<16x1xf32> to vector<16x128xf32>
    %144 = arith.mulf %141, %143 : vector<16x128xf32>
    %cst_48 = arith.constant dense<0.000000e+00> : vector<128xf32>
    %145 = vector.multi_reduction <add>, %144, %cst_48 [0] : vector<16x128xf32> to vector<128xf32>
    %146 = vector.shape_cast %145 : vector<128xf32> to vector<1x128xf32>
    %147 = arith.mulf %128, %131 : vector<1x128xf32>
    %148 = arith.addf %146, %147 : vector<1x128xf32>
    %c0_49 = arith.constant 0 : index
    %c0_50 = arith.constant 0 : index
    %149 = vector.load %arg18[%c0_49, %c0_50] : memref<8x128xf32, #tpu.memory_space<vmem>>, vector<1x128xf32>
    tpu.vector_store %arg18[%c0_49, %c0_50], %148 {strides = array<i32>} : memref<8x128xf32, #tpu.memory_space<vmem>>, vector<1x128xf32>,
    %150 = vector.extract_strided_slice %121 {offsets = [1, 0], sizes = [1, 128], strides = [1, 1]} : vector<8x128xf32> to vector<1x128xf32>
    %151 = vector.extract_strided_slice %72 {offsets = [1, 0], sizes = [1, 128], strides = [1, 1]} : vector<8x128xf32> to vector<1x128xf32>
    %152 = vector.broadcast %150 : vector<1x128xf32> to vector<16x128xf32>
    %153 = arith.mulf %152, %126 : vector<16x128xf32>
    %154 = math.exp %153 : vector<16x128xf32>
    %155 = arith.mulf %154, %141 : vector<16x128xf32>
    %156 = arith.mulf %150, %151 : vector<1x128xf32>
    %157 = vector.extract_strided_slice %80 {offsets = [0, 1], sizes = [16, 1], strides = [1, 1]} : vector<16x8xf32> to vector<16x1xf32>
    %158 = vector.broadcast %156 : vector<1x128xf32> to vector<16x128xf32>
    %159 = vector.broadcast %157 : vector<16x1xf32> to vector<16x128xf32>
    %160 = arith.mulf %158, %159 : vector<16x128xf32>
    %161 = arith.addf %155, %160 : vector<16x128xf32>
    %162 = vector.extract_strided_slice %81 {offsets = [0, 1], sizes = [16, 1], strides = [1, 1]} : vector<16x8xf32> to vector<16x1xf32>
    %163 = vector.broadcast %162 : vector<16x1xf32> to vector<16x128xf32>
    %164 = arith.mulf %161, %163 : vector<16x128xf32>
    %cst_51 = arith.constant dense<0.000000e+00> : vector<128xf32>
    %165 = vector.multi_reduction <add>, %164, %cst_51 [0] : vector<16x128xf32> to vector<128xf32>
    %166 = vector.shape_cast %165 : vector<128xf32> to vector<1x128xf32>
    %167 = arith.mulf %128, %151 : vector<1x128xf32>
    %168 = arith.addf %166, %167 : vector<1x128xf32>
    %c1 = arith.constant 1 : index
    %c0_52 = arith.constant 0 : index
    %169 = vector.load %arg18[%c1, %c0_52] : memref<8x128xf32, #tpu.memory_space<vmem>>, vector<1x128xf32>
    tpu.vector_store %arg18[%c1, %c0_52], %168 {strides = array<i32>} : memref<8x128xf32, #tpu.memory_space<vmem>>, vector<1x128xf32>,
    %170 = vector.extract_strided_slice %121 {offsets = [2, 0], sizes = [1, 128], strides = [1, 1]} : vector<8x128xf32> to vector<1x128xf32>
    %171 = vector.extract_strided_slice %72 {offsets = [2, 0], sizes = [1, 128], strides = [1, 1]} : vector<8x128xf32> to vector<1x128xf32>
    %172 = vector.broadcast %170 : vector<1x128xf32> to vector<16x128xf32>
    %173 = arith.mulf %172, %126 : vector<16x128xf32>
    %174 = math.exp %173 : vector<16x128xf32>
    %175 = arith.mulf %174, %161 : vector<16x128xf32>
    %176 = arith.mulf %170, %171 : vector<1x128xf32>
    %177 = vector.extract_strided_slice %80 {offsets = [0, 2], sizes = [16, 1], strides = [1, 1]} : vector<16x8xf32> to vector<16x1xf32>
    %178 = vector.broadcast %176 : vector<1x128xf32> to vector<16x128xf32>
    %179 = vector.broadcast %177 : vector<16x1xf32> to vector<16x128xf32>
    %180 = arith.mulf %178, %179 : vector<16x128xf32>
    %181 = arith.addf %175, %180 : vector<16x128xf32>
    %182 = vector.extract_strided_slice %81 {offsets = [0, 2], sizes = [16, 1], strides = [1, 1]} : vector<16x8xf32> to vector<16x1xf32>
    %183 = vector.broadcast %182 : vector<16x1xf32> to vector<16x128xf32>
    %184 = arith.mulf %181, %183 : vector<16x128xf32>
    %cst_53 = arith.constant dense<0.000000e+00> : vector<128xf32>
    %185 = vector.multi_reduction <add>, %184, %cst_53 [0] : vector<16x128xf32> to vector<128xf32>
    %186 = vector.shape_cast %185 : vector<128xf32> to vector<1x128xf32>
    %187 = arith.mulf %128, %171 : vector<1x128xf32>
    %188 = arith.addf %186, %187 : vector<1x128xf32>
    %c2 = arith.constant 2 : index
    %c0_54 = arith.constant 0 : index
    %189 = vector.load %arg18[%c2, %c0_54] : memref<8x128xf32, #tpu.memory_space<vmem>>, vector<1x128xf32>
    tpu.vector_store %arg18[%c2, %c0_54], %188 {strides = array<i32>} : memref<8x128xf32, #tpu.memory_space<vmem>>, vector<1x128xf32>,
    %190 = vector.extract_strided_slice %121 {offsets = [3, 0], sizes = [1, 128], strides = [1, 1]} : vector<8x128xf32> to vector<1x128xf32>
    %191 = vector.extract_strided_slice %72 {offsets = [3, 0], sizes = [1, 128], strides = [1, 1]} : vector<8x128xf32> to vector<1x128xf32>
    %192 = vector.broadcast %190 : vector<1x128xf32> to vector<16x128xf32>
    %193 = arith.mulf %192, %126 : vector<16x128xf32>
    %194 = math.exp %193 : vector<16x128xf32>
    %195 = arith.mulf %194, %181 : vector<16x128xf32>
    %196 = arith.mulf %190, %191 : vector<1x128xf32>
    %197 = vector.extract_strided_slice %80 {offsets = [0, 3], sizes = [16, 1], strides = [1, 1]} : vector<16x8xf32> to vector<16x1xf32>
    %198 = vector.broadcast %196 : vector<1x128xf32> to vector<16x128xf32>
    %199 = vector.broadcast %197 : vector<16x1xf32> to vector<16x128xf32>
    %200 = arith.mulf %198, %199 : vector<16x128xf32>
    %201 = arith.addf %195, %200 : vector<16x128xf32>
    %202 = vector.extract_strided_slice %81 {offsets = [0, 3], sizes = [16, 1], strides = [1, 1]} : vector<16x8xf32> to vector<16x1xf32>
    %203 = vector.broadcast %202 : vector<16x1xf32> to vector<16x128xf32>
    %204 = arith.mulf %201, %203 : vector<16x128xf32>
    %cst_55 = arith.constant dense<0.000000e+00> : vector<128xf32>
    %205 = vector.multi_reduction <add>, %204, %cst_55 [0] : vector<16x128xf32> to vector<128xf32>
    %206 = vector.shape_cast %205 : vector<128xf32> to vector<1x128xf32>
    %207 = arith.mulf %128, %191 : vector<1x128xf32>
    %208 = arith.addf %206, %207 : vector<1x128xf32>
    %c3 = arith.constant 3 : index
    %c0_56 = arith.constant 0 : index
    %209 = vector.load %arg18[%c3, %c0_56] : memref<8x128xf32, #tpu.memory_space<vmem>>, vector<1x128xf32>
    tpu.vector_store %arg18[%c3, %c0_56], %208 {strides = array<i32>} : memref<8x128xf32, #tpu.memory_space<vmem>>, vector<1x128xf32>,
    %210 = vector.extract_strided_slice %121 {offsets = [4, 0], sizes = [1, 128], strides = [1, 1]} : vector<8x128xf32> to vector<1x128xf32>
    %211 = vector.extract_strided_slice %72 {offsets = [4, 0], sizes = [1, 128], strides = [1, 1]} : vector<8x128xf32> to vector<1x128xf32>
    %212 = vector.broadcast %210 : vector<1x128xf32> to vector<16x128xf32>
    %213 = arith.mulf %212, %126 : vector<16x128xf32>
    %214 = math.exp %213 : vector<16x128xf32>
    %215 = arith.mulf %214, %201 : vector<16x128xf32>
    %216 = arith.mulf %210, %211 : vector<1x128xf32>
    %217 = vector.extract_strided_slice %80 {offsets = [0, 4], sizes = [16, 1], strides = [1, 1]} : vector<16x8xf32> to vector<16x1xf32>
    %218 = vector.broadcast %216 : vector<1x128xf32> to vector<16x128xf32>
    %219 = vector.broadcast %217 : vector<16x1xf32> to vector<16x128xf32>
    %220 = arith.mulf %218, %219 : vector<16x128xf32>
    %221 = arith.addf %215, %220 : vector<16x128xf32>
    %222 = vector.extract_strided_slice %81 {offsets = [0, 4], sizes = [16, 1], strides = [1, 1]} : vector<16x8xf32> to vector<16x1xf32>
    %223 = vector.broadcast %222 : vector<16x1xf32> to vector<16x128xf32>
    %224 = arith.mulf %221, %223 : vector<16x128xf32>
    %cst_57 = arith.constant dense<0.000000e+00> : vector<128xf32>
    %225 = vector.multi_reduction <add>, %224, %cst_57 [0] : vector<16x128xf32> to vector<128xf32>
    %226 = vector.shape_cast %225 : vector<128xf32> to vector<1x128xf32>
    %227 = arith.mulf %128, %211 : vector<1x128xf32>
    %228 = arith.addf %226, %227 : vector<1x128xf32>
    %c4 = arith.constant 4 : index
    %c0_58 = arith.constant 0 : index
    %229 = vector.load %arg18[%c4, %c0_58] : memref<8x128xf32, #tpu.memory_space<vmem>>, vector<1x128xf32>
    tpu.vector_store %arg18[%c4, %c0_58], %228 {strides = array<i32>} : memref<8x128xf32, #tpu.memory_space<vmem>>, vector<1x128xf32>,
    %230 = vector.extract_strided_slice %121 {offsets = [5, 0], sizes = [1, 128], strides = [1, 1]} : vector<8x128xf32> to vector<1x128xf32>
    %231 = vector.extract_strided_slice %72 {offsets = [5, 0], sizes = [1, 128], strides = [1, 1]} : vector<8x128xf32> to vector<1x128xf32>
    %232 = vector.broadcast %230 : vector<1x128xf32> to vector<16x128xf32>
    %233 = arith.mulf %232, %126 : vector<16x128xf32>
    %234 = math.exp %233 : vector<16x128xf32>
    %235 = arith.mulf %234, %221 : vector<16x128xf32>
    %236 = arith.mulf %230, %231 : vector<1x128xf32>
    %237 = vector.extract_strided_slice %80 {offsets = [0, 5], sizes = [16, 1], strides = [1, 1]} : vector<16x8xf32> to vector<16x1xf32>
    %238 = vector.broadcast %236 : vector<1x128xf32> to vector<16x128xf32>
    %239 = vector.broadcast %237 : vector<16x1xf32> to vector<16x128xf32>
    %240 = arith.mulf %238, %239 : vector<16x128xf32>
    %241 = arith.addf %235, %240 : vector<16x128xf32>
    %242 = vector.extract_strided_slice %81 {offsets = [0, 5], sizes = [16, 1], strides = [1, 1]} : vector<16x8xf32> to vector<16x1xf32>
    %243 = vector.broadcast %242 : vector<16x1xf32> to vector<16x128xf32>
    %244 = arith.mulf %241, %243 : vector<16x128xf32>
    %cst_59 = arith.constant dense<0.000000e+00> : vector<128xf32>
    %245 = vector.multi_reduction <add>, %244, %cst_59 [0] : vector<16x128xf32> to vector<128xf32>
    %246 = vector.shape_cast %245 : vector<128xf32> to vector<1x128xf32>
    %247 = arith.mulf %128, %231 : vector<1x128xf32>
    %248 = arith.addf %246, %247 : vector<1x128xf32>
    %c5 = arith.constant 5 : index
    %c0_60 = arith.constant 0 : index
    %249 = vector.load %arg18[%c5, %c0_60] : memref<8x128xf32, #tpu.memory_space<vmem>>, vector<1x128xf32>
    tpu.vector_store %arg18[%c5, %c0_60], %248 {strides = array<i32>} : memref<8x128xf32, #tpu.memory_space<vmem>>, vector<1x128xf32>,
    %250 = vector.extract_strided_slice %121 {offsets = [6, 0], sizes = [1, 128], strides = [1, 1]} : vector<8x128xf32> to vector<1x128xf32>
    %251 = vector.extract_strided_slice %72 {offsets = [6, 0], sizes = [1, 128], strides = [1, 1]} : vector<8x128xf32> to vector<1x128xf32>
    %252 = vector.broadcast %250 : vector<1x128xf32> to vector<16x128xf32>
    %253 = arith.mulf %252, %126 : vector<16x128xf32>
    %254 = math.exp %253 : vector<16x128xf32>
    %255 = arith.mulf %254, %241 : vector<16x128xf32>
    %256 = arith.mulf %250, %251 : vector<1x128xf32>
    %257 = vector.extract_strided_slice %80 {offsets = [0, 6], sizes = [16, 1], strides = [1, 1]} : vector<16x8xf32> to vector<16x1xf32>
    %258 = vector.broadcast %256 : vector<1x128xf32> to vector<16x128xf32>
    %259 = vector.broadcast %257 : vector<16x1xf32> to vector<16x128xf32>
    %260 = arith.mulf %258, %259 : vector<16x128xf32>
    %261 = arith.addf %255, %260 : vector<16x128xf32>
    %262 = vector.extract_strided_slice %81 {offsets = [0, 6], sizes = [16, 1], strides = [1, 1]} : vector<16x8xf32> to vector<16x1xf32>
    %263 = vector.broadcast %262 : vector<16x1xf32> to vector<16x128xf32>
    %264 = arith.mulf %261, %263 : vector<16x128xf32>
    %cst_61 = arith.constant dense<0.000000e+00> : vector<128xf32>
    %265 = vector.multi_reduction <add>, %264, %cst_61 [0] : vector<16x128xf32> to vector<128xf32>
    %266 = vector.shape_cast %265 : vector<128xf32> to vector<1x128xf32>
    %267 = arith.mulf %128, %251 : vector<1x128xf32>
    %268 = arith.addf %266, %267 : vector<1x128xf32>
    %c6 = arith.constant 6 : index
    %c0_62 = arith.constant 0 : index
    %269 = vector.load %arg18[%c6, %c0_62] : memref<8x128xf32, #tpu.memory_space<vmem>>, vector<1x128xf32>
    tpu.vector_store %arg18[%c6, %c0_62], %268 {strides = array<i32>} : memref<8x128xf32, #tpu.memory_space<vmem>>, vector<1x128xf32>,
    %270 = vector.extract_strided_slice %121 {offsets = [7, 0], sizes = [1, 128], strides = [1, 1]} : vector<8x128xf32> to vector<1x128xf32>
    %271 = vector.extract_strided_slice %72 {offsets = [7, 0], sizes = [1, 128], strides = [1, 1]} : vector<8x128xf32> to vector<1x128xf32>
    %272 = vector.broadcast %270 : vector<1x128xf32> to vector<16x128xf32>
    %273 = arith.mulf %272, %126 : vector<16x128xf32>
    %274 = math.exp %273 : vector<16x128xf32>
    %275 = arith.mulf %274, %261 : vector<16x128xf32>
    %276 = arith.mulf %270, %271 : vector<1x128xf32>
    %277 = vector.extract_strided_slice %80 {offsets = [0, 7], sizes = [16, 1], strides = [1, 1]} : vector<16x8xf32> to vector<16x1xf32>
    %278 = vector.broadcast %276 : vector<1x128xf32> to vector<16x128xf32>
    %279 = vector.broadcast %277 : vector<16x1xf32> to vector<16x128xf32>
    %280 = arith.mulf %278, %279 : vector<16x128xf32>
    %281 = arith.addf %275, %280 : vector<16x128xf32>
    %282 = vector.extract_strided_slice %81 {offsets = [0, 7], sizes = [16, 1], strides = [1, 1]} : vector<16x8xf32> to vector<16x1xf32>
    %283 = vector.broadcast %282 : vector<16x1xf32> to vector<16x128xf32>
    %284 = arith.mulf %281, %283 : vector<16x128xf32>
    %cst_63 = arith.constant dense<0.000000e+00> : vector<128xf32>
    %285 = vector.multi_reduction <add>, %284, %cst_63 [0] : vector<16x128xf32> to vector<128xf32>
    %286 = vector.shape_cast %285 : vector<128xf32> to vector<1x128xf32>
    %287 = arith.mulf %128, %271 : vector<1x128xf32>
    %288 = arith.addf %286, %287 : vector<1x128xf32>
    %c7 = arith.constant 7 : index
    %c0_64 = arith.constant 0 : index
    %289 = vector.load %arg18[%c7, %c0_64] : memref<8x128xf32, #tpu.memory_space<vmem>>, vector<1x128xf32>
    tpu.vector_store %arg18[%c7, %c0_64], %288 {strides = array<i32>} : memref<8x128xf32, #tpu.memory_space<vmem>>, vector<1x128xf32>,
    %c0_65 = arith.constant 0 : index
    %c0_66 = arith.constant 0 : index
    %290 = vector.load %arg18[%c0_65, %c0_66] : memref<8x128xf32, #tpu.memory_space<vmem>>, vector<8x128xf32>
    %cst_67 = arith.constant 0.000000e+00 : f32
    %291 = vector.broadcast %cst_67 : f32 to vector<8x128xf32>
    %292 = arith.subf %291, %36 : vector<8x128xf32>
    %293 = math.exp %292 : vector<8x128xf32>
    %cst_68 = arith.constant 1.000000e+00 : f32
    %294 = vector.broadcast %cst_68 : f32 to vector<8x128xf32>
    %295 = arith.addf %294, %293 : vector<8x128xf32>
    %cst_69 = arith.constant 1.000000e+00 : f32
    %296 = vector.broadcast %cst_69 : f32 to vector<8x128xf32>
    %297 = arith.divf %296, %295 : vector<8x128xf32>
    %298 = arith.mulf %36, %297 : vector<8x128xf32>
    %299 = arith.mulf %290, %298 : vector<8x128xf32>
    %300 = arith.truncf %299 : vector<8x128xf32> to vector<8x128xbf16>
    %c0_70 = arith.constant 0 : index
    %c0_71 = arith.constant 0 : index
    %c0_72 = arith.constant 0 : index
    %301 = vector.load %arg16[%c0_70, %c0_71, %c0_72] : memref<1x128x64xbf16, #tpu.memory_space<vmem>>, vector<1x128x64xbf16>
    %302 = vector.shape_cast %301 : vector<1x128x64xbf16> to vector<128x64xbf16>
    %cst_73 = arith.constant dense<0.000000e+00> : vector<8x64xf32>
    %303 = tpu.matmul %300, %302, %cst_73 {dimension_numbers = #tpu.dot_dimension_numbers<[1], [0], [0], [1], [0, 0, 1, 1], [], []>} : vector<8x128xbf16>, vector<128x64xbf16>, vector<8x64xf32> -> vector<8x64xf32>
    %304 = arith.addf %4, %303 : vector<8x64xf32>
    %c0_74 = arith.constant 0 : index
    %c0_75 = arith.constant 0 : index
    %305 = vector.load %arg4[%c0_74, %c0_75] : memref<1x64xf32, #tpu.memory_space<vmem>>, vector<1x64xf32>
    %c0_76 = arith.constant 0 : index
    %c0_77 = arith.constant 0 : index
    %306 = vector.load %arg5[%c0_76, %c0_77] : memref<1x64xf32, #tpu.memory_space<vmem>>, vector<1x64xf32>
    %cst_78 = arith.constant dense<0.000000e+00> : vector<8xf32>
    %307 = vector.multi_reduction <add>, %304, %cst_78 [1] : vector<8x64xf32> to vector<8xf32>
    %308 = vector.shape_cast %307 : vector<8xf32> to vector<8x1xf32>
    %cst_79 = arith.constant 6.400000e+01 : f32
    %309 = vector.broadcast %cst_79 : f32 to vector<8x1xf32>
    %310 = arith.divf %308, %309 : vector<8x1xf32>
    %311 = vector.broadcast %310 : vector<8x1xf32> to vector<8x64xf32>
    %312 = arith.subf %304, %311 : vector<8x64xf32>
    %313 = arith.mulf %312, %312 : vector<8x64xf32>
    %cst_80 = arith.constant dense<0.000000e+00> : vector<8xf32>
    %314 = vector.multi_reduction <add>, %313, %cst_80 [1] : vector<8x64xf32> to vector<8xf32>
    %315 = vector.shape_cast %314 : vector<8xf32> to vector<8x1xf32>
    %cst_81 = arith.constant 6.400000e+01 : f32
    %316 = vector.broadcast %cst_81 : f32 to vector<8x1xf32>
    %317 = arith.divf %315, %316 : vector<8x1xf32>
    %318 = vector.broadcast %310 : vector<8x1xf32> to vector<8x64xf32>
    %319 = arith.subf %304, %318 : vector<8x64xf32>
    %cst_82 = arith.constant 9.99999974E-6 : f32
    %320 = vector.broadcast %cst_82 : f32 to vector<8x1xf32>
    %321 = arith.addf %317, %320 : vector<8x1xf32>
    %322 = math.rsqrt %321 : vector<8x1xf32>
    %323 = vector.broadcast %322 : vector<8x1xf32> to vector<8x64xf32>
    %324 = arith.mulf %319, %323 : vector<8x64xf32>
    %325 = vector.broadcast %305 : vector<1x64xf32> to vector<8x64xf32>
    %326 = arith.mulf %324, %325 : vector<8x64xf32>
    %327 = vector.broadcast %306 : vector<1x64xf32> to vector<8x64xf32>
    %328 = arith.addf %326, %327 : vector<8x64xf32>
    %c1_i32 = arith.constant 1 : i32
    %329 = arith.cmpi eq, %arg1, %c1_i32 : i32
    %330 = arith.select %329, %328, %304 : vector<8x64xf32>
    %c0_83 = arith.constant 0 : index
    %c0_84 = arith.constant 0 : index
    %c0_85 = arith.constant 0 : index
    %331 = vector.load %arg17[%c0_83, %c0_84, %c0_85] : memref<1x8x64xf32, #tpu.memory_space<vmem>>, vector<1x8x64xf32>
    %332 = vector.shape_cast %331 : vector<1x8x64xf32> to vector<8x64xf32>
    %333 = vector.shape_cast %330 : vector<8x64xf32> to vector<1x8x64xf32>
    tpu.vector_store %arg17[%c0_83, %c0_84, %c0_85], %333 {strides = array<i32>} : memref<1x8x64xf32, #tpu.memory_space<vmem>>, vector<1x8x64xf32>,
    return
  }
  func.func @transform_0(%arg0: i32, %arg1: i32) -> (i32, i32, i32) {
    %c0_i32 = arith.constant 0 : i32
    %c0_i32_0 = arith.constant 0 : i32
    %c0_i32_1 = arith.constant 0 : i32
    return %arg0, %c0_i32, %c0_i32_0 : i32, i32, i32
  }
  func.func @transform_1(%arg0: i32, %arg1: i32) -> (i32, i32, i32) {
    %c0_i32 = arith.constant 0 : i32
    %c0_i32_0 = arith.constant 0 : i32
    %c0_i32_1 = arith.constant 0 : i32
    return %arg0, %c0_i32, %c0_i32_0 : i32, i32, i32
  }
  func.func @transform_2(%arg0: i32, %arg1: i32) -> (i32, i32) {
    %c0_i32 = arith.constant 0 : i32
    %c0_i32_0 = arith.constant 0 : i32
    %c0_i32_1 = arith.constant 0 : i32
    return %c0_i32, %c0_i32_0 : i32, i32
  }
  func.func @transform_3(%arg0: i32, %arg1: i32) -> (i32, i32) {
    %c0_i32 = arith.constant 0 : i32
    %c0_i32_0 = arith.constant 0 : i32
    %c0_i32_1 = arith.constant 0 : i32
    return %c0_i32, %c0_i32_0 : i32, i32
  }
  func.func @transform_4(%arg0: i32, %arg1: i32) -> (i32, i32, i32) {
    %c0_i32 = arith.constant 0 : i32
    %c0_i32_0 = arith.constant 0 : i32
    %c0_i32_1 = arith.constant 0 : i32
    return %arg1, %c0_i32, %c0_i32_0 : i32, i32, i32
  }
  func.func @transform_5(%arg0: i32, %arg1: i32) -> (i32, i32, i32) {
    %c0_i32 = arith.constant 0 : i32
    %c0_i32_0 = arith.constant 0 : i32
    %c0_i32_1 = arith.constant 0 : i32
    return %arg1, %c0_i32, %c0_i32_0 : i32, i32, i32
  }
  func.func @transform_6(%arg0: i32, %arg1: i32) -> (i32, i32, i32) {
    %c0_i32 = arith.constant 0 : i32
    %c0_i32_0 = arith.constant 0 : i32
    %c0_i32_1 = arith.constant 0 : i32
    return %arg1, %c0_i32, %c0_i32_0 : i32, i32, i32
  }
  func.func @transform_7(%arg0: i32, %arg1: i32) -> (i32, i32, i32) {
    %c0_i32 = arith.constant 0 : i32
    %c0_i32_0 = arith.constant 0 : i32
    %c0_i32_1 = arith.constant 0 : i32
    return %arg1, %c0_i32, %c0_i32_0 : i32, i32, i32
  }
  func.func @transform_8(%arg0: i32, %arg1: i32) -> (i32, i32, i32) {
    %c0_i32 = arith.constant 0 : i32
    %c0_i32_0 = arith.constant 0 : i32
    %c0_i32_1 = arith.constant 0 : i32
    return %arg1, %c0_i32, %c0_i32_0 : i32, i32, i32
  }
  func.func @transform_9(%arg0: i32, %arg1: i32) -> (i32, i32, i32) {
    %c0_i32 = arith.constant 0 : i32
    %c0_i32_0 = arith.constant 0 : i32
    %c0_i32_1 = arith.constant 0 : i32
    return %arg1, %c0_i32, %c0_i32_0 : i32, i32, i32
  }
  func.func @transform_10(%arg0: i32, %arg1: i32) -> (i32, i32, i32) {
    %c0_i32 = arith.constant 0 : i32
    %c0_i32_0 = arith.constant 0 : i32
    %c0_i32_1 = arith.constant 0 : i32
    return %arg1, %c0_i32, %c0_i32_0 : i32, i32, i32
  }
  func.func @transform_11(%arg0: i32, %arg1: i32) -> (i32, i32, i32) {
    %c0_i32 = arith.constant 0 : i32
    %c0_i32_0 = arith.constant 0 : i32
    %c0_i32_1 = arith.constant 0 : i32
    return %arg1, %c0_i32, %c0_i32_0 : i32, i32, i32
  }
  func.func @transform_12(%arg0: i32, %arg1: i32) -> (i32, i32, i32) {
    %c0_i32 = arith.constant 0 : i32
    %c0_i32_0 = arith.constant 0 : i32
    %c0_i32_1 = arith.constant 0 : i32
    return %arg1, %c0_i32, %c0_i32_0 : i32, i32, i32
  }
  func.func @transform_13(%arg0: i32, %arg1: i32) -> (i32, i32, i32) {
    %c0_i32 = arith.constant 0 : i32
    %c0_i32_0 = arith.constant 0 : i32
    %c0_i32_1 = arith.constant 0 : i32
    return %arg1, %c0_i32, %c0_i32_0 : i32, i32, i32
  }
  func.func @transform_14(%arg0: i32, %arg1: i32) -> (i32, i32, i32) {
    %c0_i32 = arith.constant 0 : i32
    %c0_i32_0 = arith.constant 0 : i32
    %c0_i32_1 = arith.constant 0 : i32
    return %arg1, %c0_i32, %c0_i32_0 : i32, i32, i32
  }
  func.func @transform_15(%arg0: i32, %arg1: i32) -> (i32, i32, i32) {
    %c0_i32 = arith.constant 0 : i32
    %c0_i32_0 = arith.constant 0 : i32
    %c0_i32_1 = arith.constant 0 : i32
    return %arg0, %c0_i32, %c0_i32_0 : i32, i32, i32
  }
}

</mosaic_0001>

<bundles_post_ra>
// kernel: tpu_custom_call.1
= control target key start
LH: loop header
LB: loop body
LE: loop exit
PB: predicated region body
PF: predicated region fallthrough
CT: control target
= control target key end

     0   :  { %s2956_s0 = inlined_call_operand.vmem [shape: f32[2,8,64], index: 0, kind: input, shape index: {}]   ;;  %s2957_s1 = inlined_call_operand.vmem [shape: f32[2,8,64], index: 1, kind: input, shape index: {}]   ;;  %s2958_s2 = inlined_call_operand.vmem [shape: f32[1,64], index: 2, kind: input, shape index: {}]   ;;  %s2959_s3 = inlined_call_operand.vmem [shape: f32[1,64], index: 3, kind: input, shape index: {}]   ;;  %s2960_s4 = inlined_call_operand.vmem [shape: f32[2,1,64], index: 4, kind: input, shape index: {}]   ;;  %s2961_s5 = inlined_call_operand.vmem [shape: f32[2,1,64], index: 5, kind: input, shape index: {}]   ;;  %s2962_s6 = inlined_call_operand.vmem [shape: bf16[2,64,256], index: 6, kind: input, shape index: {}]   ;;  %s2963_s7 = inlined_call_operand.vmem [shape: f32[2,4,128], index: 7, kind: input, shape index: {}]   ;;  %s2964_s8 = inlined_call_operand.vmem [shape: f32[2,1,128], index: 8, kind: input, shape index: {}]   ;;  %s2965_s9 = inlined_call_operand.vmem [shape: bf16[2,128,36], index: 9, kind: input, shape index: {}]   ;;  %s2966_s10 = inlined_call_operand.vmem [shape: f32[2,4,128], index: 10, kind: input, shape index: {}]   ;;  %s2967_s11 = inlined_call_operand.vmem [shape: f32[2,1,128], index: 11, kind: input, shape index: {}]   ;;  %s2968_s12 = inlined_call_operand.vmem [shape: f32[2,16,128], index: 12, kind: input, shape index: {}]   ;;  %s2969_s13 = inlined_call_operand.vmem [shape: f32[2,1,128], index: 13, kind: input, shape index: {}]   ;;  %s2970_s14 = inlined_call_operand.vmem [shape: bf16[2,128,64], index: 14, kind: input, shape index: {}]   ;;  %s2971_s15 = inlined_call_operand.hbm [shape: f32[2,8,64], index: 15, kind: output, shape index: {}]  }
   0x1   :  { %2987 = sst [smem:[#allocation19_spill]] %s2956_s0 }
   0x2   :  { %2988 = sst [smem:[#allocation20_spill]] %s2957_s1 }
   0x3   :  { %2989 = sst [smem:[#allocation21_spill]] %s2958_s2 }
   0x4   :  { %2990 = sst [smem:[#allocation22_spill]] %s2959_s3 }
   0x5   :  { %2991 = sst [smem:[#allocation23_spill]] %s2962_s6 }
   0x6   :  { %2992 = sst [smem:[#allocation24_spill]] %s2963_s7 }
   0x7   :  { %2993 = sst [smem:[#allocation25_spill]] %s2964_s8 }
   0x8   :  { %2994 = sst [smem:[#allocation26_spill]] %s2965_s9 }
   0x9   :  { %2995 = sst [smem:[#allocation27_spill]] %s2968_s12 }
   0xa   :  { %2996 = sst [smem:[#allocation28_spill]] %s2970_s14 }
   0xb   :  { %2997 = sst [smem:[#allocation29_spill]] %s2971_s15 }
   0xc   :  { %20 = vsyncpa [#allocation4], 0 }
   0xd   :  { %22 = vsyncpa [#allocation4 + $0x1], 0  ;;  %s2425_s18 = smov 0   ;;  %s2427_s19 = smov 0  }
   0xe   :  { %s2429_s20 = smov 0   ;;  %s2431_s21 = smov 0  }
   0xf   :  { %s2433_s22 = smov 0   ;;  %s2435_s23 = smov 0  }
  0x10   :  { %s2437_s24 = smov 0   ;;  %s2439_s25 = smov 0  }
  0x11 LB: > { %2998 = sst [smem:[#allocation6_spill]] %s2302_s18  ;;  %s1922_s26 = sadd.s32 4294967295, %s2330_s25   ;;  %s2330_s25 = sphi %s2439_s25, %s28_s25   ;;  %s2326_s24 = sphi %s2437_s24, %s3043_s24   ;;  %s2322_s23 = sphi %s2435_s23, %s3042_s23   ;;  %s2318_s22 = sphi %s2433_s22, %s3041_s22   ;;  %s2314_s21 = sphi %s2431_s21, %s3040_s21   ;;  %s2310_s20 = sphi %s2429_s20, %s3039_s20   ;;  %s2306_s19 = sphi %s2427_s19, %s3038_s19   ;;  %s2302_s18 = sphi %s2425_s18, %s3037_s18  }
  0x12   : > { %2999 = sst [smem:[#allocation7_spill]] %s2306_s19  ;;  %s1923_s27 = sadd.s32 4294967294, %s2330_s25  }
  0x13   : > { %3000 = sst [smem:[#allocation8_spill]] %s2310_s20  ;;  %s37_s28 = sadd.s32 1, %s2322_s23 }
  0x14   : > { %3001 = sst [smem:[#allocation9_spill]] %s2314_s21  ;;  %p38_p0 = scmp.ge.s32.totalorder %s37_s28, 2 }
  0x15   : > { %3002 = sst [smem:[#allocation10_spill]] %s2318_s22  ;;  %s40_s29 = sadd.s32 1, %s2326_s24 }
  0x16   : > { %3003 = sst [smem:[#allocation11_spill]] %s2322_s23  ;;  %p437_p1 = scmp.ne.s32.totalorder %s2310_s20, %s2306_s19 }
  0x17   : > { %3004 = sst [smem:[#allocation12_spill]] %s2326_s24  ;;  %p438_p2 = scmp.eq.s32.totalorder %s1922_s26, 3 }
  0x18   : > { %3005 = sst [smem:[#allocation13_spill]] %s2330_s25  ;;  %s3045_s28 = smov (%p38_p0, %s37_s28), 0 }
  0x19   : > { %3006 = sst [smem:[#allocation14_spill]] %s3045_s28  ;;  %s3047_s29 = smov (!%p38_p0, %s40_s29), %s2326_s24 }
  0x1a   : > { %p2474_p3 = por %p438_p2, %p437_p1  ;;  %p443_p4 = scmp.ne.s32.totalorder %s2306_s19, %s2302_s18 }
  0x1b   : > { %p42_p5 = scmp.ge.s32.totalorder %s3047_s29, 2  ;;  %p444_p6 = scmp.eq.s32.totalorder %s1923_s27, 3 }
  0x1c   : > { %s3007_s30 = scalar_select %p2474_p3, 1, 0 }
  0x1d   : > { %p1926_p7 = scmp.ge.s32.totalorder %s2330_s25, 1  ;;  %p558_p8 = scmp.lt.s32.totalorder %s2330_s25, 5 }
  0x1e   : > { %3008 = sst [smem:[#allocation15_spill]] %s3007_s30  ;;  %s3049_s29 = smov (%p42_p5, %s3047_s29), 0 }
  0x1f   : > { %3009 = sst [smem:[#allocation16_spill]] %s3049_s29  ;;  %p2484_p9 = por %p444_p6, %p443_p4 }
  0x20   : > { %p559_p10 = pnand %p1926_p7, %p558_p8  ;;  %s424_s17 = ssub.s32 %s2326_s24, %s3049_s29 }
  0x21   : > { %s3010_s16 = scalar_select %p2484_p9, 1, 0 }
  0x22   : > { %s427_s26 = sadd.s32 1, %s2310_s20  ;;  %p425_p11 = scmp.eq.s32.totalorder %s424_s17, 0 }
  0x23   : > { %3011 = sst [smem:[#allocation17_spill]] %s3010_s16  ;;  %562 = sbr.rel (%p559_p10) target bundleno = 1812 (0x714), region = 80 }
  0x24   : > { %s2492_s28 = scalar_select %p425_p11, %s2310_s20, %s427_s26  }
  0x25   : > { %s2978_s27 = sand.u32 (!%p559_p10), 1, %s2306_s19   ;;  %p652_p12 = scmp.lt.s32.totalorder (!%p559_p10), %s2318_s22, 1 }
  0x26   : > { %3012 = sst [smem:[#allocation18_spill]] %s2492_s28  ;;  %s1927_s23 = sshll.u32 (!%p559_p10), %s2978_s27, 3 }
  0x27   : > { %p660_p13 = scmp.lt.s32.totalorder (!%p559_p10), %s2314_s21, 1  ;;  %s3013_s0 = sld [smem:[#allocation19_spill]] (!%p559_p10) }
  0x28   : > { %s653_s18 = scalar_select %p652_p12, %s2318_s22, 1 }
  0x29   : > { %s2501_s16 = scalar_select %p660_p13, %s2314_s21, 1 }
  0x2a   : > { %s1928_s17 = sshll.u32 %s653_s18, 3  ;;  %s3014_s1 = sld [smem:[#allocation20_spill]] }
  0x2b   : > { %s1976_s22 = sshll.u32 %s2501_s16, 6  ;;  %s1932_s21 = sshll.u32 %s2501_s16, 2 }
  0x2c   : > { %s3015_s6 = sld [smem:[#allocation23_spill]]  ;;  %s2541_s14 = scalar_lea.vmem %s2966_s10, %s1932_s21 }
  0x2d   : > { %s655_s24 = scalar_lea.vmem %s3013_s0, %s1928_s17  ;;  %s3016_s7 = sld [smem:[#allocation24_spill]] }
  0x2e   : > { %s3018_s9 = sld [smem:[#allocation26_spill]]  ;;  %s689_s29 = scalar_lea.vmem %s2967_s11, %s2501_s16 }
  0x2f   : > { %s1978_s26 = sshll.u32 %s2501_s16, 4  ;;  %s697_s28 = scalar_lea.vmem %s2969_s13, %s2501_s16 }
  0x30   : > { %s659_s27 = scalar_lea.vmem %s3014_s1, %s1928_s17  ;;  %s3020_s8 = sld [smem:[#allocation28_spill]] }
  0x31   : > { %s3021_s30 = sld [smem:[#allocation9_spill]] }
  0x32   : > { %s2522_s12 = scalar_lea.vmem %s3015_s6, %s1976_s22 }
  0x33   : > { %s2527_s20 = scalar_lea.vmem %s3016_s7, %s1932_s21  ;;  %s3019_s7 = sld [smem:[#allocation27_spill]] }
  0x34   : > { %s2536_s2 = scalar_lea.vmem %s3018_s9, %s1976_s22  ;;  %s2562_s21 = scalar_lea.vmem [#allocation3], %s1927_s23 }
  0x36   : > { %s2560_s19 = scalar_lea.vmem %s3020_s8, %s1976_s22 }
  0x37   : > { %p1940_p0 = scmp.ne.s32.totalorder %s3021_s30, 0 }
  0x39   : > { %s2555_s3 = scalar_lea.vmem %s3019_s7, %s1978_s26  ;;  %707 = sbr.rel (%p1940_p0) target bundleno = 67 (0x43), region = 84 }
  0x3e   : > { %v708_v0 = vld [vmem:[%s655_s24] sm:$0xff]  ;;  %vm711_vm0 = vcmask 523264  }
  0x3f   : > { %v709_v1 = vld [vmem:[%s659_s27] sm:$0xff] }
  0x40   : > { %v710_v2 = vadd.f32 %v709_v1, %v708_v0 }
  0x42   : > { %712 = vst.msk [vmem:[%s2562_s21] sm:$0xff] %vm711_vm0, %v710_v2 }
  0x43 PF: > { %vm716_vm1 = vcmask 523264   ;;  %v2157_v10 = vld [vmem:[%s2522_s12 + $0x34] ss:$8 sps:$4 sm:$0xff]   ;;  %v2159_v11 = vld [vmem:[%s2522_s12 + $0x30] ss:$8 sps:$4 sm:$0xff]   ;;  %v2332_v14 = vmov 0   ;;  %s3022_s6 = scalar_lea.vmem %s2960_s4, %s2501_s16  ;;  %s3023_s9 = scalar_lea.vmem %s2961_s5, %s2501_s16  ;;  %v851_v39 = vlaneseq }
  0x44   : > { %v2160_v12 = vld [vmem:[%s2522_s12 + $0x24] ss:$8 sps:$4 sm:$0xff]   ;;  %805 = vmatprep.subr.bf16.mxu0 %v2157_v10  ;;  %v2162_v13 = vld [vmem:[%s2522_s12 + $0x20] ss:$8 sps:$4 sm:$0xff]   ;;  %829 = vmatprep.mubr.bf16.mxu0 %v2332_v14  ;;  %v2163_v15 = vld [vmem:[%s2522_s12 + $0x14] ss:$8 sps:$4 sm:$0xff]  }
  0x45   : > { %806 = vmatpush1.bf16.msra.mxu0 %v2159_v11  ;;  %2121 = vset.pattern.permute.xlu1 %v2332_v14  ;;  %v2165_v16 = vld [vmem:[%s2522_s12 + $0x10] ss:$8 sps:$4 sm:$0xff]   ;;  %v2166_v17 = vld [vmem:[%s2522_s12 + $0x4] ss:$8 sps:$4 sm:$0xff]   ;;  %v2168_v18 = vld [vmem:[%s2522_s12] ss:$8 sps:$4 sm:$0xff]  }
  0x46   : > { %807 = vmatprep.subr.bf16.mxu0 %v2160_v12  ;;  %v1941_v23 = vld [vmem:[%s3022_s6] ss:$0 sm:$0xff]  ;;  %v2169_v29 = vld [vmem:[%s2536_s2 + $0x38] sm:$0xff]   ;;  %v2333_v30 = vmov 0.0   ;;  %v2170_v31 = vld [vmem:[%s2536_s2 + $0x30] sm:$0xff]   ;;  %vm2334_vm2 = vmmov 0  }
  0x47   : > { %v1942_v25 = vld [vmem:[%s3023_s9] ss:$0 sm:$0xff]  ;;  %1998 = vmatprep.subr.bf16.mxu1 %v2333_v30  ;;  %v2171_v32 = vld [vmem:[%s2536_s2 + $0x28] sm:$0xff]   ;;  %v2173_v34 = vld [vmem:[%s2536_s2 + $0x18] sm:$0xff]   ;;  %2014 = vmatprep.mubr.msk.bf16.mxu1 %vm2334_vm2, %v2333_v30  ;;  %v2335_v38 = vmov 1   ;;  %v2610_v40 = vshrl.u32 %v851_v39, 7 }
  0x48   : > { %1999 = vmatpush3.bf16.msra.mxu1 %v2169_v29  ;;  %v2172_v33 = vld [vmem:[%s2536_s2 + $0x20] sm:$0xff]   ;;  %v2174_v35 = vld [vmem:[%s2536_s2 + $0x10] sm:$0xff]   ;;  %v2175_v36 = vld [vmem:[%s2536_s2 + $0x8] sm:$0xff]   ;;  %2122 = vset.pattern.permute.xlu0 %v2335_v38  ;;  %vm842_vm3 = vcmask 1042432   ;;  %s3024_s23 = sld [smem:[#allocation25_spill]]  ;;  %vm865_vm4 = vcmask 1046528  }
  0x49   : > { %v713_v3 = vld [vmem:[%s2562_s21] sm:$0xff]  ;;  %808 = vmatpush1.bf16.msra.mxu0 %v2162_v13  ;;  %2000 = vmatprep.subr.bf16.mxu1 %v2333_v30  ;;  %v2176_v37 = vld [vmem:[%s2536_s2] sm:$0xff]   ;;  %v2613_v41 = vsub.s32 1, %v2610_v40  ;;  %v2616_v42 = vsub.s32 2, %v2610_v40  ;;  %v2619_v43 = vsub.s32 3, %v2610_v40  ;;  %v2623_v45 = vsub.s32 0, %v2610_v40 }
  0x4a   : > { %v717_v4 = vsel %vm716_vm1, %v713_v3, 0.0  ;;  %809 = vmatprep.subr.bf16.mxu0 %v2163_v15  ;;  %v838_v44 = vld [vmem:[%s2527_s20] sm:$0xf]  ;;  %vm879_vm5 = vcmask 1045504   ;;  %vm893_vm6 = vcmask 1044480   ;;  %s2336_s27 = smov 124  }
  0x4b   : > { %718 = vadd.xlane.f32.xlu0 %v717_v4  ;;  %v860_v46 = vrot.slane %v838_v44, %v2613_v41  ;;  %v874_v47 = vrot.slane %v838_v44, %v2616_v42  ;;  %v888_v48 = vrot.slane %v838_v44, %v2619_v43  ;;  %v854_v50 = vrot.slane %v838_v44, %v2623_v45  ;;  %s3027_s18 = sld [smem:[#allocation10_spill]]  ;;  %s1723_s6 = sshll.u32 %s2562_s21, 4  ;;  %s1724_s6 = int_to_ptr.vmem [resolvable:$true] %s1723_s6 }
  0x4c   : > { %2001 = vmatpush3.bf16.msra.mxu1 %v2170_v31  ;;  %s3031_s0 = sld [smem:[#allocation22_spill]] }
  0x4d   : > { %810 = vmatpush1.bf16.msra.mxu0 %v2165_v16  ;;  %2002 = vmatprep.subr.bf16.mxu1 %v2333_v30  ;;  %s3032_s9 = sld [smem:[#allocation29_spill]] }
  0x4e   : > { %811 = vmatprep.subr.bf16.mxu0 %v2166_v17  ;;  %s3025_s24 = scalar_lea.vmem %s3024_s23, %s2501_s16  ;;  %s3026_s16 = sld [smem:[#allocation9_spill]] }
  0x4f   : > { %v1952_v54 = vld [vmem:[%s3025_s24] ss:$0 sm:$0xff]  ;;  %s2238_s24 = scalar_lea.vmem %s1724_s6, 128 }
  0x50   : > { %2003 = vmatpush3.bf16.msra.mxu1 %v2171_v32  ;;  %p2239_p2 = scmp.ne.s32.totalorder %s1724_s6, %s2238_s24 }
  0x51   : > { %812 = vmatpush1.bf16.msra.mxu0 %v2168_v18  ;;  %2004 = vmatprep.subr.bf16.mxu1 %v2333_v30  ;;  %s1973_s1 = sshll.u32 %s3027_s18, 7 }
  0x52   : > { %2018 = vmatprep.subr.bf16.mxu0 %v2333_v30  ;;  %p2240_p4 = pnand %p2239_p2, %p2474_p3 }
  0x53   : > { %s2906_s12 = scalar_lea.hbm %s3032_s9, %s1973_s1 }
  0x54   : > { %2005 = vmatpush3.bf16.msra.mxu1 %v2172_v33  ;;  %v1961_v33 = vld [vmem:[%s689_s29] ss:$0 sm:$0xff]  ;;  %p1703_p1 = scmp.eq.s32.totalorder %s3026_s16, 1  ;;  %s3028_s29 = sld [smem:[#allocation7_spill]] }
  0x55   : > { %2006 = vmatprep.subr.bf16.mxu1 %v2333_v30  ;;  %p2241_p5 = pneg %p2240_p4 }
  0x56   : > { %s1704_s26 = scalar_select %p1703_p1, 1, 0 }
  0x58   : > { %2007 = vmatpush3.bf16.msra.mxu1 %v2173_v34 }
  0x59   : > { %2008 = vmatprep.subr.bf16.mxu1 %v2333_v30 }
  0x5a   : > { %s3033_s22 = sand.u32 1, %s3028_s29  }
  0x5b   : > { %s1710_s23 = scalar_lea.sflag [#allocation4], %s3033_s22 }
  0x5c   : > { %2009 = vmatpush3.bf16.msra.mxu1 %v2174_v35 }
  0x5d   : > { %2010 = vmatprep.subr.bf16.mxu1 %v2333_v30 }
  0x60   : > { %2011 = vmatpush3.bf16.msra.mxu1 %v2175_v36 }
  0x61   : > { %2012 = vmatprep.subr.bf16.mxu1 %v2333_v30 }
  0x64   : > { %2013 = vmatpush3.bf16.msra.mxu1 %v2176_v37 }
  0xd4   : > { %v719_v5 = vpop.xlane.xlu0 %718 }
  0xd5   : > { %v721_v6 = vmul.f32 0.015625, %v719_v5 }
  0xd7   : > { %v722_v7 = vsub.f32 %v713_v3, %v721_v6 }
  0xd9   : > { %v723_v8 = vmul.f32 %v722_v7, %v722_v7 }
  0xdb   : > { %v724_v9 = vsel %vm716_vm1, %v723_v8, 0.0 }
  0xdc   : > { %725 = vadd.xlane.f32.xlu0 %v724_v9 }
 0x165   : > { %v726_v19 = vpop.xlane.xlu0 %725 }
 0x166   : > { %v727_v20 = vmul.f32 0.015625, %v726_v19 }
 0x168   : > { %v728_v21 = vadd.f32 1e-05, %v727_v20 }
 0x16a   : > { %2185 = vrsqrt.f32 %v728_v21 }
 0x177   : > { %v2186_v22 = vpop.eup %2185 }
 0x178   : > { %v730_v24 = vmul.f32 %v2186_v22, %v722_v7 }
 0x17a   : > { %v737_v26 = vmul.f32 %v1941_v23, %v730_v24 }
 0x17c   : > { %v744_v27 = vadd.f32 %v1942_v25, %v737_v26  ;;  %v2337_v25 = vmov 2   ;;  %v2338_v26 = vmov 3  }
 0x17e   : > { %v745_v28 = vpack.c.bf16 %v744_v27, %v744_v27 }
 0x180   : > { %1951 = vmatmul.mubr.msk.bf16.vlgmr.msra.gmra.mxu0 %vm716_vm1, %v745_v28  ;;  %v2644_v28 = vld [vmem:[%s2541_s14] sm:$0xf] }
 0x181   : > { %2034 = vmatprep.mubr.msk.bf16.mxu0 %vm2334_vm2, %v2333_v30  ;;  %v1062_v29 = vrot.slane %v2644_v28, %v2623_v45  ;;  %v1072_v31 = vrot.slane %v2644_v28, %v2613_v41  ;;  %v1082_v36 = vrot.slane %v2644_v28, %v2616_v42 }
 0x240   : > { %v831_v49 = vpop.f32.mrf.mxu0 }
 0x241   : > { %v840_v51 = vrot.slane %v831_v49, 5  ;;  %v2339_v49 = vmov 5  }
 0x242   : > { %v2629_v52 = vpop.f32.mrf.mxu0 }
 0x243   : > { %v843_v53 = vsel %vm842_vm3, 0.0, %v840_v51  ;;  %v862_v55 = vmul.f32 %v860_v46, %v840_v51  ;;  %v876_v56 = vmul.f32 %v874_v47, %v840_v51  ;;  %v890_v57 = vmul.f32 %v888_v48, %v840_v51 }
 0x244   : > { %v855_v58 = vmul.f32 %v854_v50, %v843_v53  ;;  %v861_v59 = vmul.f32 %v860_v46, %v843_v53  ;;  %v875_v60 = vmul.f32 %v874_v47, %v843_v53  ;;  %v889_v61 = vmul.f32 %v888_v48, %v843_v53  ;;  %v835_v62 = vpop.f32.mrf.mxu0 }
 0x245   : > { %v867_v63 = vrot.slane %v862_v55, 1  ;;  %v881_v3 = vrot.slane %v876_v56, 2  ;;  %v895_v7 = vrot.slane %v890_v57, 3  ;;  %v2340_v53 = vmov 6  }
 0x246   : > { %v856_v0 = vadd.f32 %v1952_v54, %v855_v58  ;;  %v866_v1 = vrot.slane %v861_v59, 1  ;;  %v880_v2 = vrot.slane %v875_v60, 2  ;;  %v836_v4 = vpop.f32.mrf.mxu0  ;;  %v894_v6 = vrot.slane %v889_v61, 3 }
 0x247   : > { %v2341_v55 = vmov 4   ;;  %v2342_v56 = vmov 7   ;;  %v1092_v58 = vrot.slane %v2644_v28, %v2619_v43 }
 0x248   : > { %v868_v5 = vsel %vm865_vm4, %v866_v1, %v867_v63  ;;  %v882_v9 = vsel %vm879_vm5, %v880_v2, %v881_v3  ;;  %v896_v11 = vsel %vm893_vm6, %v894_v6, %v895_v7  ;;  %v2177_v1 = vld [vmem:[%s2560_s19 + $0x38] sm:$0xff]   ;;  %v1104_v2 = vld [vmem:[%s2555_s3] sm:$0xff]  ;;  %v2178_v3 = vld [vmem:[%s2560_s19 + $0x30] sm:$0xff]  }
 0x249   : > { %v870_v8 = vadd.f32 %v868_v5, %v856_v0  ;;  %2019 = vmatpush3.bf16.msra.mxu0 %v2177_v1  ;;  %v1106_v4 = vmul.f32 1.442695, %v1104_v2  ;;  %v2179_v5 = vld [vmem:[%s2560_s19 + $0x28] sm:$0xff]   ;;  %v2180_v7 = vld [vmem:[%s2560_s19 + $0x20] sm:$0xff]  }
 0x24a   : > { %2020 = vmatprep.subr.bf16.mxu0 %v2333_v30  ;;  %v1105_v6 = vld [vmem:[%s2555_s3 + $0x8] sm:$0xff]  ;;  %s3029_s3 = sld [smem:[#allocation21_spill]] }
 0x24b   : > { %v884_v10 = vadd.f32 %v882_v9, %v870_v8  ;;  %v1108_v8 = vmul.f32 1.442695, %v1105_v6 }
 0x24d   : > { %v898_v12 = vadd.f32 %v896_v11, %v884_v10  ;;  %2021 = vmatpush3.bf16.msra.mxu0 %v2178_v3  ;;  %v2181_v10 = vld [vmem:[%s2560_s19 + $0x18] sm:$0xff]  }
 0x24e   : > { %2022 = vmatprep.subr.bf16.mxu0 %v2333_v30 }
 0x24f   : > { %v899_v13 = vsub.f32 0.0, %v898_v12 }
 0x251   : > { %v900_v15 = vmul.f32 1.442695, %v899_v13  ;;  %2023 = vmatpush3.bf16.msra.mxu0 %v2179_v5 }
 0x252   : > { %2024 = vmatprep.subr.bf16.mxu0 %v2333_v30 }
 0x253   : > { %2187 = vpow2.f32 %v900_v15 }
 0x255   : > { %2025 = vmatpush3.bf16.msra.mxu0 %v2180_v7  ;;  %v1404_v7 = vsub.s32 5, %v2610_v40 }
 0x256   : > { %2026 = vmatprep.subr.bf16.mxu0 %v2333_v30 }
 0x259   : > { %2027 = vmatpush3.bf16.msra.mxu0 %v2181_v10 }
 0x25a   : > { %2028 = vmatprep.subr.bf16.mxu0 %v2333_v30 }
 0x260   : > { %v2188_v16 = vpop.eup %2187 }
 0x261   : > { %v902_v17 = vadd.f32 1.0, %v2188_v16 }
 0x263   : > { %2189 = vrcp.f32 %v902_v17  ;;  %v2183_v17 = vld [vmem:[%s2560_s19 + $0x8] sm:$0xff]  }
 0x270   : > { %v2190_v18 = vpop.eup %2189 }
 0x271   : > { %v2636_v19 = vmul.f32 %v2190_v18, %v898_v12  ;;  %v2182_v12 = vld [vmem:[%s2560_s19 + $0x10] sm:$0xff]  }
 0x272   : > { %2029 = vmatpush3.bf16.msra.mxu0 %v2182_v12 }
 0x273   : > { %v906_v20 = vpack.c.bf16 %v2636_v19, %v2636_v19  ;;  %2030 = vmatprep.subr.bf16.mxu0 %v2333_v30 }
 0x275   : > { %2015 = vmatmul.mubr.bf16.vlgmr.msra.gmra.mxu1 %v906_v20 }
 0x276   : > { %2031 = vmatpush3.bf16.msra.mxu0 %v2183_v17 }
 0x277   : > { %2032 = vmatprep.subr.bf16.mxu0 %v2333_v30 }
 0x335   : > { %v1005_v21 = vpop.f32.mrf.mxu1 }
 0x336   : > { %1066 = vperm.xlu0 %2122, %v1005_v21   ;;  %1012 = vrot.lane.b32.xlu1 %v1005_v21, %s2336_s27  ;;  %s2344_s27 = smov [#allocation3]  }
 0x337   : > { %v2016_v22 = vpop.f32.mrf.mxu1  ;;  %s2242_s20 = sshll.u32 %s2344_s27, 4  ;;  %s2243_s20 = int_to_ptr.vmem [resolvable:$false] %s2242_s20 }
 0x338   : > { %s2244_s15 = scalar_lea.vmem %s2243_s20, 256  ;;  %p2245_p6 = scmp.lt.s32.totalorder %s1724_s6, %s2243_s20 }
 0x339   : > { %v1008_v23 = vpop.f32.mrf.mxu1  ;;  %p2246_p7 = scmp.lt.s32.totalorder %s2244_s15, %s2238_s24 }
 0x33a   : > { %1056 = vperm.xlu1 %2121, %v1005_v21   ;;  %2125 = vset.pattern.permute.xlu0 %v2332_v14 }
 0x33b   : > { %v2017_v24 = vpop.f32.mrf.mxu1  ;;  %p2247_p8 = por %p2246_p7, %p2245_p6 }
 0x33d   : > { %p2248_p10 = pnand %p2247_p8, %p2241_p5 }
 0x33e   : > { %2123 = vset.pattern.permute.xlu1 %v2337_v25 }
 0x33f   : > { %1076 = vperm.xlu1 %2123, %v1005_v21  }
 0x343   : > { %2124 = vset.pattern.permute.xlu1 %v2338_v26 }
 0x344   : > { %1086 = vperm.xlu1 %2124, %v1005_v21   ;;  %v2184_v21 = vld [vmem:[%s2560_s19] sm:$0xff]  }
 0x345   : > { %2033 = vmatpush3.bf16.msra.mxu0 %v2184_v21 }
 0x3a8   : > { %v1013_v27 = vpop.permute.xlu1 %1012 }
 0x3a9   : > { %1015 = vxpose.xlu1.b32.start.end [1/1] (short) (narrow) %v1013_v27, 32 }
 0x3b1   : > { %v1067_v32 = vpop.permute.xlu0 %1066 }
 0x3b2   : > { %v1073_v37 = vmul.f32 %v1072_v31, %v1067_v32 }
 0x3b5   : > { %v1057_v34 = vpop.permute.xlu1 %1056 }
 0x3b6   : > { %v1063_v35 = vmul.f32 %v1062_v29, %v1057_v34 }
 0x3b8   : > { %v1064_v39 = vadd.f32 %v1961_v33, %v1063_v35 }
 0x3ba   : > { %v1074_v44 = vadd.f32 %v1073_v37, %v1064_v39  ;;  %v1077_v46 = vpop.permute.xlu1 %1076 }
 0x3bb   : > { %v1083_v47 = vmul.f32 %v1082_v36, %v1077_v46 }
 0x3bd   : > { %v1084_v48 = vadd.f32 %v1083_v47, %v1074_v44 }
 0x3bf   : > { %v1087_v50 = vpop.permute.xlu1 %1086 }
 0x3c0   : > { %v1093_v59 = vmul.f32 %v1092_v58, %v1087_v50 }
 0x3c2   : > { %v1094_v60 = vadd.f32 %v1093_v59, %v1084_v48 }
 0x3c4   : > { %v1096_v62 = vand.u32 2147483647, %v1094_v60  ;;  %v1095_v13 = vmax.f32 %v1094_v60, 0.0 }
 0x3c6   : > { %v1097_v63 = vsub.f32 0.0, %v1096_v62 }
 0x3c7   : > { %2130 = vset.pattern.permute.xlu1 %v2339_v49 }
 0x3c8   : > { %v1098_v0 = vmul.f32 1.442695, %v1097_v63 }
 0x3ca   : > { %2191 = vpow2.f32 %v1098_v0 }
 0x425   : > { %v1031_v51 = vpop.trf.xlu1 }
 0x426   : > { %1419 = vperm.xlu1 %2130, %v1031_v51   ;;  %1132 = vperm.xlu0 %2125, %v1031_v51  }
 0x429   : > { %v1032_v54 = vpop.trf.xlu1 }
 0x42a   : > { %2131 = vset.pattern.permute.xlu1 %v2340_v53  ;;  %2126 = vset.pattern.permute.xlu0 %v2335_v38 }
 0x42b   : > { %1476 = vperm.xlu1 %2131, %v1031_v51   ;;  %1183 = vperm.xlu0 %2126, %v1031_v51  }
 0x42d   : > { %v1033_v57 = vpop.trf.xlu1 }
 0x42f   : > { %2133 = vset.pattern.permute.xlu1 %v2332_v14  ;;  %2127 = vset.pattern.permute.xlu0 %v2337_v25 }
 0x430   : > { %1255 = vperm.xlu0 %2127, %v1031_v51   ;;  %1137 = vperm.xlu1 %2133, %v1032_v54  }
 0x431   : > { %v1034_v61 = vpop.trf.xlu1 }
 0x434   : > { %2128 = vset.pattern.permute.xlu0 %v2338_v26  ;;  %2137 = vset.pattern.permute.xlu1 %v2341_v55 }
 0x435   : > { %1305 = vperm.xlu0 %2128, %v1031_v51   ;;  %1359 = vperm.xlu1 %2137, %v1032_v54  }
 0x439   : > { %2129 = vset.pattern.permute.xlu0 %v2341_v55  ;;  %2139 = vset.pattern.permute.xlu1 %v2340_v53 }
 0x43a   : > { %1355 = vperm.xlu0 %2129, %v1031_v51   ;;  %1480 = vperm.xlu1 %2139, %v1032_v54  }
 0x43e   : > { %2132 = vset.pattern.permute.xlu0 %v2342_v56  ;;  %2140 = vset.pattern.permute.xlu1 %v2342_v56 }
 0x43f   : > { %1526 = vperm.xlu0 %2132, %v1031_v51   ;;  %1530 = vperm.xlu1 %2140, %v1032_v54  }
 0x443   : > { %2134 = vset.pattern.permute.xlu0 %v2335_v38  ;;  %2141 = vset.pattern.permute.xlu1 %v2332_v14 }
 0x444   : > { %1187 = vperm.xlu0 %2134, %v1032_v54   ;;  %1146 = vperm.xlu1 %2141, %v1033_v57  }
 0x448   : > { %2135 = vset.pattern.permute.xlu0 %v2337_v25  ;;  %2142 = vset.pattern.permute.xlu1 %v2335_v38 }
 0x449   : > { %1259 = vperm.xlu0 %2135, %v1032_v54   ;;  %1195 = vperm.xlu1 %2142, %v1033_v57  }
 0x44d   : > { %2136 = vset.pattern.permute.xlu0 %v2338_v26  ;;  %2144 = vset.pattern.permute.xlu1 %v2338_v26 }
 0x44e   : > { %1309 = vperm.xlu0 %2136, %v1032_v54   ;;  %1317 = vperm.xlu1 %2144, %v1033_v57  }
 0x452   : > { %2138 = vset.pattern.permute.xlu0 %v2339_v49  ;;  %2145 = vset.pattern.permute.xlu1 %v2341_v55 }
 0x453   : > { %1423 = vperm.xlu0 %2138, %v1032_v54   ;;  %1367 = vperm.xlu1 %2145, %v1033_v57  }
 0x457   : > { %2143 = vset.pattern.permute.xlu0 %v2337_v25  ;;  %2147 = vset.pattern.permute.xlu1 %v2340_v53 }
 0x458   : > { %1267 = vperm.xlu0 %2143, %v1033_v57   ;;  %1488 = vperm.xlu1 %2147, %v1033_v57  }
 0x45c   : > { %2146 = vset.pattern.permute.xlu0 %v2339_v49  ;;  %2149 = vset.pattern.permute.xlu1 %v2335_v38 }
 0x45d   : > { %1431 = vperm.xlu0 %2146, %v1033_v57   ;;  %1199 = vperm.xlu1 %2149, %v1034_v61  }
 0x461   : > { %2148 = vset.pattern.permute.xlu0 %v2332_v14  ;;  %2150 = vset.pattern.permute.xlu1 %v2337_v25  ;;  %v2192_v14 = vpop.eup %2191 }
 0x462   : > { %1271 = vperm.xlu1 %2150, %v1034_v61   ;;  %1151 = vperm.xlu0 %2148, %v1034_v61   ;;  %v1100_v38 = vadd.f32 1.0, %v2192_v14 }
 0x464   : > { %2193 = vlog2.f32 %v1100_v38 }
 0x465   : > { %2195 = vpow2.f32 %v1106_v4 }
 0x466   : > { %2152 = vset.pattern.permute.xlu1 %v2341_v55  ;;  %2151 = vset.pattern.permute.xlu0 %v2338_v26  ;;  %2197 = vpow2.f32 %v1108_v8 }
 0x467   : > { %1371 = vperm.xlu1 %2152, %v1034_v61   ;;  %1321 = vperm.xlu0 %2151, %v1034_v61  }
 0x46b   : > { %2153 = vset.pattern.permute.xlu1 %v2339_v49  ;;  %2154 = vset.pattern.permute.xlu0 %v2340_v53 }
 0x46c   : > { %1435 = vperm.xlu1 %2153, %v1034_v61   ;;  %1492 = vperm.xlu0 %2154, %v1034_v61  }
 0x470   : > { %2155 = vset.pattern.permute.xlu1 %v2342_v56  ;;  %2156 = vset.pattern.permute.xlu0 %v2342_v56 }
 0x471   : > { %1538 = vperm.xlu1 %2155, %v1033_v57   ;;  %v2194_v9 = vpop.eup %2193  ;;  %v1340_v57 = vsub.s32 4, %v2610_v40 }
 0x472   : > { %v1102_v11 = vmul.f32 0.6931472, %v2194_v9  ;;  %v2196_v16 = vpop.eup %2195 }
 0x473   : > { %v2699_v18 = vsub.f32 0.0, %v2196_v16  ;;  %v2198_v23 = vpop.eup %2197 }
 0x474   : > { %v2695_v15 = vadd.f32 %v1102_v11, %v1095_v13  ;;  %v2708_v26 = vsub.f32 0.0, %v2198_v23 }
 0x475   : > { %1542 = vperm.xlu1 %2155, %v1034_v61  }
 0x476   : > { %v1116_v20 = vrot.slane %v2695_v15, %v2623_v45  ;;  %v1169_v24 = vrot.slane %v2695_v15, %v2613_v41  ;;  %v1241_v30 = vrot.slane %v2695_v15, %v2616_v42  ;;  %v2721_v37 = vmul.f32 %v2695_v15, %v2636_v19 }
 0x477   : > { %v1291_v51 = vrot.slane %v2695_v15, %v2619_v43  ;;  %v1341_v38 = vrot.slane %v2695_v15, %v1340_v57  ;;  %v1405_v17 = vrot.slane %v2695_v15, %v1404_v7 }
 0x478   : > { %v1117_v22 = vmul.f32 %v1116_v20, %v2699_v18  ;;  %v1170_v29 = vmul.f32 %v1169_v24, %v2699_v18  ;;  %v1118_v31 = vmul.f32 %v1116_v20, %v2708_v26  ;;  %v1242_v36 = vmul.f32 %v1241_v30, %v2699_v18 }
 0x479   : > { %v1171_v39 = vmul.f32 %v1169_v24, %v2708_v26  ;;  %v1129_v48 = vrot.slane %v2721_v37, %v2623_v45  ;;  %v1243_v50 = vmul.f32 %v1241_v30, %v2708_v26  ;;  %v1292_v45 = vmul.f32 %v1291_v51, %v2699_v18 }
 0x47a   : > { %v1119_v25 = vmul.f32 1.442695, %v1117_v22  ;;  %v1172_v32 = vmul.f32 1.442695, %v1170_v29  ;;  %v1121_v35 = vmul.f32 1.442695, %v1118_v31  ;;  %v1293_v61 = vmul.f32 %v1291_v51, %v2708_v26 }
 0x47b   : > { %v1244_v47 = vmul.f32 1.442695, %v1242_v36  ;;  %v1174_v49 = vmul.f32 1.442695, %v1171_v39  ;;  %v1246_v59 = vmul.f32 1.442695, %v1243_v50  ;;  %v1181_v14 = vrot.slane %v2721_v37, %v2613_v41 }
 0x47c   : > { %2199 = vpow2.f32 %v1119_v25  ;;  %v1294_v1 = vmul.f32 1.442695, %v1292_v45  ;;  %v1296_v6 = vmul.f32 1.442695, %v1293_v61  ;;  %v1342_v9 = vmul.f32 %v1341_v38, %v2699_v18 }
 0x47d   : > { %2201 = vpow2.f32 %v1172_v32  ;;  %v1343_v11 = vmul.f32 %v1341_v38, %v2708_v26  ;;  %v1253_v20 = vrot.slane %v2721_v37, %v2616_v42  ;;  %v1406_v30 = vmul.f32 %v1405_v17, %v2699_v18 }
 0x47e   : > { %2203 = vpow2.f32 %v1121_v35  ;;  %v1344_v21 = vmul.f32 1.442695, %v1342_v9  ;;  %v1407_v36 = vmul.f32 %v1405_v17, %v2708_v26  ;;  %v1303_v51 = vrot.slane %v2721_v37, %v2619_v43 }
 0x47f   : > { %2205 = vpow2.f32 %v1244_v47  ;;  %v1346_v23 = vmul.f32 1.442695, %v1343_v11  ;;  %v1353_v9 = vrot.slane %v2721_v37, %v1340_v57 }
 0x480   : > { %2207 = vpow2.f32 %v1174_v49  ;;  %v1408_v49 = vmul.f32 1.442695, %v1406_v30  ;;  %v1410_v45 = vmul.f32 1.442695, %v1407_v36 }
 0x481   : > { %2209 = vpow2.f32 %v1246_v59 }
 0x482   : > { %2211 = vpow2.f32 %v1294_v1 }
 0x483   : > { %2213 = vpow2.f32 %v1296_v6  ;;  %v1511_v6 = vsub.s32 7, %v2610_v40 }
 0x484   : > { %2215 = vpow2.f32 %v1344_v21 }
 0x485   : > { %2217 = vpow2.f32 %v1346_v23 }
 0x486   : > { %2219 = vpow2.f32 %v1408_v49 }
 0x487   : > { %2221 = vpow2.f32 %v1410_v45 }
 0x489   : > { %v2200_v53 = vpop.eup %2199 }
 0x48a   : > { %v1123_v58 = vmul.f32 0.0, %v2200_v53  ;;  %v2202_v0 = vpop.eup %2201 }
 0x48b   : > { %v2204_v2 = vpop.eup %2203 }
 0x48c   : > { %v1124_v8 = vmul.f32 0.0, %v2204_v2  ;;  %v2206_v16 = vpop.eup %2205 }
 0x48d   : > { %v2208_v22 = vpop.eup %2207 }
 0x48e   : > { %v2210_v42 = vpop.eup %2209 }
 0x48f   : > { %v2212_v53 = vpop.eup %2211 }
 0x4a1   : > { %v1133_v27 = vpop.permute.xlu0 %1132  ;;  %v2710_v28 = vpop.permute.xlu1 %1419 }
 0x4a2   : > { %v1140_v54 = vmul.f32 %v1133_v27, %v1129_v48 }
 0x4a4   : > { %v2735_v60 = vadd.f32 %v1140_v54, %v1123_v58  ;;  %v2343_v58 = vmov 1966171168  }
 0x4a5   : > { %v1213_v59 = vunpack.c.l.s4 %v2343_v58 }
 0x4a6   : > { %v1184_v33 = vpop.permute.xlu0 %1183  ;;  %v2716_v34 = vpop.permute.xlu1 %1476  ;;  %v1176_v3 = vmul.f32 %v2202_v0, %v2735_v60 }
 0x4a7   : > { %v1190_v4 = vmul.f32 %v1184_v33, %v1181_v14  ;;  %v1461_v33 = vsub.s32 6, %v2610_v40 }
 0x4a9   : > { %v2755_v12 = vadd.f32 %v1190_v4, %v1176_v3  ;;  %v1462_v50 = vrot.slane %v2695_v15, %v1461_v33  ;;  %v1214_v4 = vunpack.c.0.s8 %v1213_v59 }
 0x4ab   : > { %v1256_v44 = vpop.permute.xlu0 %1255  ;;  %v1138_v46 = vpop.permute.xlu1 %1137  ;;  %v1248_v27 = vmul.f32 %v2206_v16, %v2755_v12  ;;  %v1463_v2 = vmul.f32 %v1462_v50, %v2699_v18  ;;  %v2801_v21 = vsub.s32 %v1214_v4, %v2610_v40 }
 0x4ac   : > { %v1141_v5 = vmul.f32 %v1138_v46, %v1129_v48  ;;  %v1262_v29 = vmul.f32 %v1256_v44, %v1253_v20 }
 0x4ae   : > { %v2757_v13 = vadd.f32 %v1141_v5, %v1124_v8  ;;  %v2773_v39 = vadd.f32 %v1262_v29, %v1248_v27  ;;  %v1464_v5 = vmul.f32 %v1462_v50, %v2708_v26  ;;  %v1383_v50 = vcombine.high %v2636_v19, %v2636_v19 }
 0x4b0   : > { %v2729_v55 = vpop.permute.xlu0 %1305  ;;  %v2731_v56 = vpop.permute.xlu1 %1359  ;;  %v1177_v31 = vmul.f32 %v2208_v22, %v2757_v13  ;;  %v1298_v0 = vmul.f32 %v2212_v53, %v2773_v39  ;;  %v1467_v22 = vmul.f32 1.442695, %v1464_v5 }
 0x4b1   : > { %v1312_v61 = vmul.f32 %v2729_v55, %v1303_v51  ;;  %v1465_v55 = vmul.f32 1.442695, %v1463_v2 }
 0x4b3   : > { %v2791_v8 = vadd.f32 %v1312_v61, %v1298_v0  ;;  %2223 = vpow2.f32 %v1465_v55 }
 0x4b4   : > { %2225 = vpow2.f32 %v1467_v22 }
 0x4b5   : > { %v2738_v62 = vpop.permute.xlu0 %1355  ;;  %v2740_v63 = vpop.permute.xlu1 %1480 }
 0x4b6   : > { %v1362_v23 = vmul.f32 %v2738_v62, %v1353_v9  ;;  %v1363_v62 = vmul.f32 %v2731_v56, %v1353_v9 }
 0x4ba   : > { %v2750_v10 = vpop.permute.xlu0 %1526  ;;  %v2752_v41 = vpop.permute.xlu1 %1530 }
 0x4bf   : > { %v1188_v24 = vpop.permute.xlu0 %1187  ;;  %v2764_v25 = vpop.permute.xlu1 %1146 }
 0x4c0   : > { %v1191_v32 = vmul.f32 %v1188_v24, %v1181_v14  ;;  %v2214_v14 = vpop.eup %2213  ;;  %v1512_v24 = vrot.slane %v2695_v15, %v1511_v6 }
 0x4c2   : > { %v2770_v35 = vadd.f32 %v1191_v32, %v1177_v31  ;;  %v1560_v31 = vsub.f32 0.0, %v2629_v52  ;;  %v1513_v36 = vmul.f32 %v1512_v24, %v2699_v18 }
 0x4c4   : > { %v1260_v46 = vpop.permute.xlu0 %1259  ;;  %v1249_v47 = vmul.f32 %v2210_v42, %v2770_v35  ;;  %v1196_v44 = vpop.permute.xlu1 %1195  ;;  %v1218_v42 = vrot.slane %v2636_v19, %v2801_v21  ;;  %v1561_v49 = vmul.f32 1.442695, %v1560_v31  ;;  %v1515_v53 = vmul.f32 1.442695, %v1513_v36 }
 0x4c5   : > { %v1263_v48 = vmul.f32 %v1260_v46, %v1253_v20  ;;  %v2216_v20 = vpop.eup %2215  ;;  %v1514_v46 = vmul.f32 %v1512_v24, %v2708_v26  ;;  %v1202_v26 = vmul.f32 %v1196_v44, %v2755_v12  ;;  %v2836_v12 = vld [vmem:[%s697_s28] sm:$0x1] }
 0x4c6   : > { %v1348_v27 = vmul.f32 %v2216_v20, %v2791_v8  ;;  %v2218_v29 = vpop.eup %2217  ;;  %v1219_v56 = vcombine.high %v1218_v42, %v1218_v42  ;;  %2227 = vpow2.f32 %v1561_v49 }
 0x4c7   : > { %v2781_v54 = vadd.f32 %v1263_v48, %v1249_v47  ;;  %v2220_v48 = vpop.eup %2219  ;;  %v1517_v61 = vmul.f32 1.442695, %v1514_v46  ;;  %2229 = vpow2.f32 %v1515_v53 }
 0x4c8   : > { %v1364_v15 = vadd.f32 %v1362_v23, %v1348_v27  ;;  %v2222_v45 = vpop.eup %2221  ;;  %v1474_v27 = vrot.slane %v2721_v37, %v1461_v33 }
 0x4c9   : > { %v1310_v38 = vpop.permute.xlu0 %1309  ;;  %v2785_v1 = vpop.permute.xlu1 %1317  ;;  %v1299_v3 = vmul.f32 %v2214_v14, %v2781_v54  ;;  %v1226_v14 = vrot.slane %v1218_v42, %v2801_v21  ;;  %2231 = vpow2.f32 %v1517_v61 }
 0x4ca   : > { %v1313_v43 = vmul.f32 %v1310_v38, %v1303_v51  ;;  %v1417_v51 = vrot.slane %v2721_v37, %v1404_v7  ;;  %v1412_v58 = vmul.f32 %v2220_v48, %v1364_v15  ;;  %v2224_v24 = vpop.eup %2223 }
 0x4cb   : > { %v1283_v55 = vcombine.high %v1226_v14, %v1226_v14 }
 0x4cc   : > { %v2796_v11 = vadd.f32 %v1313_v43, %v1299_v3  ;;  %v1426_v38 = vmul.f32 %v2710_v28, %v1417_v51  ;;  %v2829_v3 = vrot.slane %v1383_v50, %v2801_v21  ;;  %v1154_v28 = vmul.f32 %v2764_v25, %v2735_v60 }
 0x4cd   : > { %v2851_v60 = vmul.f32 %v2836_v12, %v2636_v19  ;;  %v1285_v19 = vmul.f32 %v1283_v55, %v2836_v12 }
 0x4ce   : > { %v1424_v16 = vpop.permute.xlu0 %1423  ;;  %v2798_v17 = vpop.permute.xlu1 %1367  ;;  %v1349_v57 = vmul.f32 %v2218_v29, %v2796_v11  ;;  %v1428_v4 = vadd.f32 %v1426_v38, %v1412_v58  ;;  %v2855_v25 = vrot.slane %v2829_v3, %v2801_v21 }
 0x4cf   : > { %v1427_v43 = vmul.f32 %v1424_v16, %v1417_v51  ;;  %v1374_v51 = vmul.f32 %v2798_v17, %v1364_v15 }
 0x4d0   : > { %v1365_v47 = vadd.f32 %v1363_v62, %v1349_v57  ;;  %v1469_v57 = vmul.f32 %v2224_v24, %v1428_v4  ;;  %v1324_v62 = vmul.f32 %v2785_v1, %v2791_v8 }
 0x4d2   : > { %v1413_v2 = vmul.f32 %v2222_v45, %v1365_v47 }
 0x4d3   : > { %v1268_v32 = vpop.permute.xlu0 %1267  ;;  %v2810_v30 = vpop.permute.xlu1 %1488 }
 0x4d4   : > { %v1429_v20 = vadd.f32 %v1427_v43, %v1413_v2  ;;  %v1274_v16 = vmul.f32 %v1268_v32, %v2773_v39  ;;  %v1483_v32 = vmul.f32 %v2716_v34, %v1474_v27 }
 0x4d8   : > { %v2822_v59 = vpop.permute.xlu0 %1431  ;;  %v1200_v18 = vpop.permute.xlu1 %1199 }
 0x4d9   : > { %v1203_v0 = vmul.f32 %v1200_v18, %v2770_v35  ;;  %v2839_v35 = vrot.slane %v1219_v56, %v2801_v21  ;;  %v1484_v56 = vmul.f32 %v2740_v63, %v1474_v27  ;;  %v1485_v18 = vadd.f32 %v1483_v32, %v1469_v57 }
 0x4da   : > { %v1438_v15 = vmul.f32 %v2822_v59, %v1428_v4 }
 0x4db   : > { %v1204_v7 = vadd.f32 %v1203_v0, %v1202_v26  ;;  %v1235_v33 = vmul.f32 %v2839_v35, %v2836_v12  ;;  %v1333_v1 = vcombine.high %v2839_v35, %v2839_v35  ;;  %v1495_v14 = vmul.f32 %v2810_v30, %v1485_v18 }
 0x4dc   : > { %v1524_v30 = vrot.slane %v2721_v37, %v1511_v6 }
 0x4dd   : > { %v1205_v44 = vrot.slane %v1204_v7, 4  ;;  %v1152_v5 = vpop.permute.xlu0 %1151  ;;  %v1272_v9 = vpop.permute.xlu1 %1271 }
 0x4de   : > { %v1155_v22 = vmul.f32 %v1152_v5, %v2757_v13  ;;  %v1275_v23 = vmul.f32 %v1272_v9, %v2781_v54  ;;  %v1447_v13 = vcombine.high %v2829_v3, %v2829_v3  ;;  %v2226_v54 = vpop.eup %2225  ;;  %v1533_v37 = vmul.f32 %v2750_v10, %v1524_v30 }
 0x4df   : > { %v1206_v29 = vadd.f32 %v1205_v44, %v1204_v7  ;;  %v1470_v50 = vmul.f32 %v2226_v54, %v1429_v20  ;;  %v1534_v6 = vmul.f32 %v2752_v41, %v1524_v30  ;;  %v1399_v10 = vmul.f32 %v2855_v25, %v2836_v12 }
 0x4e0   : > { %v1156_v39 = vadd.f32 %v1155_v22, %v1154_v28  ;;  %v1276_v31 = vadd.f32 %v1275_v23, %v1274_v16  ;;  %v2228_v28 = vpop.eup %2227 }
 0x4e1   : > { %v1207_v42 = vrot.slane %v1206_v29, 2  ;;  %v1486_v17 = vadd.f32 %v1484_v56, %v1470_v50  ;;  %v2230_v35 = vpop.eup %2229  ;;  %v1335_v56 = vmul.f32 %v1333_v1, %v2836_v12 }
 0x4e2   : > { %v1157_v36 = vrot.slane %v1156_v39, 4  ;;  %v1277_v46 = vrot.slane %v1276_v31, 4  ;;  %v1322_v48 = vpop.permute.xlu0 %1321  ;;  %v1372_v49 = vpop.permute.xlu1 %1371 }
 0x4e3   : > { %v1208_v53 = vadd.f32 %v1207_v42, %v1206_v29  ;;  %v1325_v58 = vmul.f32 %v1322_v48, %v2796_v11  ;;  %v1375_v34 = vmul.f32 %v1372_v49, %v1365_v47  ;;  %v2232_v24 = vpop.eup %2231 }
 0x4e4   : > { %v1158_v45 = vadd.f32 %v1157_v36, %v1156_v39  ;;  %v1278_v61 = vadd.f32 %v1277_v46, %v1276_v31  ;;  %v1519_v31 = vmul.f32 %v2230_v35, %v1485_v18  ;;  %v1520_v54 = vmul.f32 %v2232_v24, %v1486_v17 }
 0x4e5   : > { %v1209_v26 = vrot.slane %v1208_v53, 1  ;;  %v1326_v8 = vadd.f32 %v1325_v58, %v1324_v62  ;;  %v1376_v0 = vadd.f32 %v1375_v34, %v1374_v51 }
 0x4e6   : > { %v1159_v38 = vrot.slane %v1158_v45, 2  ;;  %v1279_v2 = vrot.slane %v1278_v61, 2  ;;  %v1535_v58 = vadd.f32 %v1533_v37, %v1519_v31  ;;  %v1536_v34 = vadd.f32 %v1534_v6, %v1520_v54 }
 0x4e7   : > { %v1210_v11 = vadd.f32 %v1209_v26, %v1208_v53  ;;  %v1327_v47 = vrot.slane %v1326_v8, 4  ;;  %v1377_v7 = vrot.slane %v1376_v0, 4  ;;  %v1493_v63 = vpop.permute.xlu0 %1492  ;;  %v1436_v43 = vpop.permute.xlu1 %1435 }
 0x4e8   : > { %v1160_v44 = vadd.f32 %v1159_v38, %v1158_v45  ;;  %v1280_v5 = vadd.f32 %v1279_v2, %v1278_v61  ;;  %v1496_v55 = vmul.f32 %v1493_v63, %v1486_v17  ;;  %v1439_v9 = vmul.f32 %v1436_v43, %v1429_v20 }
 0x4e9   : > { %v1236_v16 = vadd.f32 %v1235_v33, %v1210_v11  ;;  %v1328_v22 = vadd.f32 %v1327_v47, %v1326_v8  ;;  %v1378_v23 = vadd.f32 %v1377_v7, %v1376_v0  ;;  %v1504_v8 = vcombine.high %v2855_v25, %v2855_v25 }
 0x4ea   : > { %v1161_v59 = vrot.slane %v1160_v44, 1  ;;  %v1281_v4 = vrot.slane %v1280_v5, 1  ;;  %v1497_v27 = vadd.f32 %v1496_v55, %v1495_v14  ;;  %v1440_v29 = vadd.f32 %v1439_v9, %v1438_v15 }
 0x4eb   : > { %1237 = vst [vmem:[#allocation2 + $0x1] sm:$0x1] %v1236_v16  ;;  %v1329_v57 = vrot.slane %v1328_v22, 2  ;;  %v1379_v39 = vrot.slane %v1378_v23, 2  ;;  %v1454_v14 = vrot.slane %v1447_v13, %v2801_v21  ;;  %v1563_v47 = vadd.f32 1.0, %v2228_v28 }
 0x4ec   : > { %v1162_v32 = vadd.f32 %v1161_v59, %v1160_v44  ;;  %v1282_v20 = vadd.f32 %v1281_v4, %v1280_v5  ;;  %v1498_v42 = vrot.slane %v1497_v27, 4  ;;  %v1441_v62 = vrot.slane %v1440_v29, 4  ;;  %v1539_v40 = vpop.permute.xlu1 %1538 }
 0x4ed   : > { %v1330_v33 = vadd.f32 %v1329_v57, %v1328_v22  ;;  %v1380_v36 = vadd.f32 %v1379_v39, %v1378_v23  ;;  %v1506_v63 = vmul.f32 %v1504_v8, %v2836_v12  ;;  %v1456_v25 = vmul.f32 %v1454_v14, %v2836_v12 }
 0x4ee   : > { %v1164_v46 = vadd.f32 %v2851_v60, %v1162_v32  ;;  %v1286_v48 = vadd.f32 %v1285_v19, %v1282_v20  ;;  %v1499_v49 = vadd.f32 %v1498_v42, %v1497_v27  ;;  %v1442_v50 = vadd.f32 %v1441_v62, %v1440_v29  ;;  %v2237_v29 = vld [vmem:[%s2562_s21] sm:$0xff] }
 0x4ef   : > { %v1331_v51 = vrot.slane %v1330_v33, 1  ;;  %v1381_v53 = vrot.slane %v1380_v36, 1  ;;  %v1545_v60 = vmul.f32 %v1539_v40, %v1535_v58  ;;  %2233 = vrcp.f32 %v1563_v47 }
 0x4f0   : > { %1165 = vst [vmem:[#allocation2] sm:$0x1] %v1164_v46  ;;  %1287 = vst [vmem:[#allocation2 + $0x2] sm:$0x1] %v1286_v48  ;;  %v1500_v18 = vrot.slane %v1499_v49, 2  ;;  %v1443_v41 = vrot.slane %v1442_v50, 2  ;;  %v1543_v45 = vpop.permute.xlu1 %1542  ;;  %v1554_v13 = vcombine.high %v1454_v14, %v1454_v14  ;;  %v1705_v48 = vstv %s1704_s26 }
 0x4f1   : > { %v1332_v61 = vadd.f32 %v1331_v51, %v1330_v33  ;;  %v1382_v26 = vadd.f32 %v1381_v53, %v1380_v36  ;;  %v1546_v19 = vmul.f32 %v1543_v45, %v1536_v34  ;;  %v1970_v36 = vld [vmem:[%s3029_s3] ss:$0 sm:$0xff]  ;;  %vm1706_vm7 = vcmp.eq.s32.totalorder %v1705_v48, 1 }
 0x4f2   : > { %v1501_v0 = vadd.f32 %v1500_v18, %v1499_v49  ;;  %v1444_v1 = vadd.f32 %v1443_v41, %v1442_v50  ;;  %v1556_v35 = vmul.f32 %v1554_v13, %v2836_v12  ;;  %v1971_v49 = vld [vmem:[%s3031_s0] ss:$0 sm:$0xff] }
 0x4f3   : > { %v1336_v38 = vadd.f32 %v1335_v56, %v1332_v61  ;;  %v1400_v2 = vadd.f32 %v1399_v10, %v1382_v26  ;;  %v1547_v17 = vadd.f32 %v1546_v19, %v1545_v60 }
 0x4f4   : > { %v1502_v15 = vrot.slane %v1501_v0, 1  ;;  %v1445_v11 = vrot.slane %v1444_v1, 1 }
 0x4f5   : > { %1337 = vst [vmem:[#allocation2 + $0x3] sm:$0x1] %v1336_v38  ;;  %1401 = vst [vmem:[#allocation2 + $0x4] sm:$0x1] %v1400_v2  ;;  %v1548_v7 = vrot.slane %v1547_v17, 4 }
 0x4f6   : > { %v1503_v43 = vadd.f32 %v1502_v15, %v1501_v0  ;;  %v1446_v44 = vadd.f32 %v1445_v11, %v1444_v1 }
 0x4f7   : > { %v1549_v5 = vadd.f32 %v1548_v7, %v1547_v17 }
 0x4f8   : > { %v1507_v55 = vadd.f32 %v1506_v63, %v1503_v43  ;;  %v1457_v3 = vadd.f32 %v1456_v25, %v1446_v44 }
 0x4f9   : > { %v1550_v21 = vrot.slane %v1549_v5, 2 }
 0x4fa   : > { %1508 = vst [vmem:[#allocation2 + $0x6] sm:$0x1] %v1507_v55  ;;  %1458 = vst [vmem:[#allocation2 + $0x5] sm:$0x1] %v1457_v3 }
 0x4fb   : > { %v1551_v9 = vadd.f32 %v1550_v21, %v1549_v5 }
 0x4fc   : > { %v2234_v22 = vpop.eup %2233 }
 0x4fd   : > { %v1552_v28 = vrot.slane %v1551_v9, 1  ;;  %v1566_v23 = vmul.f32 %v2234_v22, %v2629_v52 }
 0x4ff   : > { %v1553_v30 = vadd.f32 %v1552_v28, %v1551_v9 }
 0x501   : > { %v1557_v16 = vadd.f32 %v1556_v35, %v1553_v30 }
 0x503   : > { %1558 = vst [vmem:[#allocation2 + $0x7] sm:$0x1] %v1557_v16 }
 0x50a   : > { %v1559_v24 = vld [vmem:[#allocation2] sm:$0xff] }
 0x50b   : > { %v1567_v59 = vmul.f32 %v1566_v23, %v1559_v24 }
 0x50d   : > { %v1568_v4 = vpack.c.bf16 %v1567_v59, %v1567_v59 }
 0x50f   : > { %2035 = vmatmul.mubr.bf16.vlgmr.msra.gmra.mxu0 %v1568_v4 }
 0x5cf   : > { %v1667_v27 = vpop.f32.mrf.mxu0 }
 0x5d0   : > { %v1673_v57 = vadd.f32 %v2237_v29, %v1667_v27 }
 0x5d1   : > { %v2036_v39 = vpop.f32.mrf.mxu0 }
 0x5d2   : > { %v1676_v31 = vsel %vm716_vm1, %v1673_v57, 0.0 }
 0x5d3   : > { %1677 = vadd.xlane.f32.xlu0 %v1676_v31  ;;  %v1670_v54 = vpop.f32.mrf.mxu0 }
 0x5d5   : > { %v2037_v12 = vpop.f32.mrf.mxu0 }
 0x65c   : > { %v1678_v32 = vpop.xlane.xlu0 %1677 }
 0x65d   : > { %v1679_v20 = vmul.f32 0.015625, %v1678_v32 }
 0x65f   : > { %v1680_v42 = vsub.f32 %v1673_v57, %v1679_v20 }
 0x661   : > { %v1681_v62 = vmul.f32 %v1680_v42, %v1680_v42 }
 0x663   : > { %v1682_v52 = vsel %vm716_vm1, %v1681_v62, 0.0 }
 0x664   : > { %1683 = vadd.xlane.f32.xlu1 %v1682_v52 }
 0x6ed   : > { %v1684_v40 = vpop.xlane.xlu1 %1683 }
 0x6ee   : > { %v1685_v37 = vmul.f32 0.015625, %v1684_v40 }
 0x6f0   : > { %v1686_v6 = vadd.f32 1e-05, %v1685_v37 }
 0x6f2   : > { %2235 = vrsqrt.f32 %v1686_v6 }
 0x6ff   : > { %v2236_v33 = vpop.eup %2235 }
 0x700   : > { %v1688_v46 = vmul.f32 %v2236_v33, %v1680_v42 }
 0x702   : > { %v1695_v50 = vmul.f32 %v1970_v36, %v1688_v46 }
 0x704   : > { %v1702_v51 = vadd.f32 %v1971_v49, %v1695_v50 }
 0x706   : > { %v1707_v53 = vsel %vm1706_vm7, %v1702_v51, %v1673_v57 }
 0x707   : > { %1708 = vst.msk [vmem:[%s2562_s21] sm:$0xff] %vm716_vm1, %v1707_v53 }
 0x708   : > { %2251 = shalt.err (!%p2248_p10)
}
 0x709   : > { %s2252_s21 = scalar_lea.hbm %s2906_s12, 128  ;;  %s2256_s16 = scalar_lea.hbm %s3032_s9, 256 }
 0x70a   : > { %p2253_p11 = scmp.ne.s32.totalorder %s2906_s12, %s2252_s21  ;;  %p2257_p0 = scmp.lt.s32.totalorder %s2906_s12, %s3032_s9 }
 0x70b   : > { %p2258_p1 = scmp.lt.s32.totalorder %s2256_s16, %s2252_s21 }
 0x70c   : > { %p2254_p12 = pnand %p2253_p11, %p2474_p3 }
 0x70d   : > { %p2259_p2 = por %p2258_p1, %p2257_p0 }
 0x70e   : > { %p2255_p13 = pneg %p2254_p12 }
 0x710   : > { %p2260_p4 = pnand %p2259_p2, %p2255_p13 }
 0x712   : > { %2263 = shalt.err (!%p2260_p4)
}
 0x713   : > { %2038 = dma.vmem_to_hbm [thread:$0]  (%p2474_p3), %s1724_s6, 128, %s2906_s12, %s1710_s23  }
 0x714 PF: > { %s3034_s26 = sld [smem:[#allocation13_spill]] }
 0x715   : > { %s3035_s28 = sld [smem:[#allocation6_spill]] }
 0x71a   : > { %p2044_p5 = scmp.ge.s32.totalorder %s3034_s26, 2 }
 0x71b   : > { %s1735_s3 = sand.u32 1, %s3035_s28  }
 0x71c   : > { %p2041_p6 = pnand %p2044_p5, %p2484_p9  ;;  %s1736_s19 = scalar_lea.sflag [#allocation4], %s1735_s3 }
 0x71e   : > { %p2042_p7 = pneg %p2041_p6 }
 0x720   : > { %2297 = dma.done.wait (%p2042_p7), %s1736_s19, 128  }
 0x721   : > { %2299 = vsyncadd (%p2042_p7), %s1736_s19, 4294967168  ;;  %s28_s25 = sadd.s32 1, %s3034_s26   ;;  %s3037_s18 = sld [smem:[#allocation7_spill]] }
 0x722   : > { %p25_p8 = scmp.ge.s32.totalorder %s28_s25, 6   ;;  %s3038_s19 = sld [smem:[#allocation8_spill]] }
 0x723   : > { %s3039_s20 = sld [smem:[#allocation18_spill]] }
 0x724   : > { %s3040_s21 = sld [smem:[#allocation11_spill]]  ;;  %27 = sbr.rel (!%p25_p8) target bundleno = 17 (0x11), region = 155 }
 0x725   : > { %s3041_s22 = sld [smem:[#allocation12_spill]] }
 0x726   : > { %s3042_s23 = sld [smem:[#allocation14_spill]] }
 0x727   : > { %s3043_s24 = sld [smem:[#allocation16_spill]] }
 0x729   :  { %1741 = vsyncpa [#allocation4], 1 }
 0x72a   :  { %1743 = vsyncpa [#allocation4 + $0x1], 1 }

</bundles_post_ra>
